<compile_context>
chip_gen: v7x
topology: tpu7x:2x2x1
jax: 0.10.0
libtpu: 0.0.40
codegen_flags: <defaults>
</compile_context>

<pallas_src>
import math
import functools

import jax
import jax.numpy as jnp
from jax.experimental import pallas as pl
from jax.experimental.pallas import tpu as pltpu


def _vmem_limit_bytes() -> int:
    """Generation-aware VMEM cap: ~3/4 of physical (96 MiB v5e/v6e, 48 MiB v7x)."""
    cap = 64 * 1024 * 1024  # conservative fallback (v7x-sized physical VMEM)
    try:
        cap = int(pltpu.get_tpu_info().vmem_capacity_bytes)
    except Exception:
        pass
    return min((cap // 4) * 3, 112 * 1024 * 1024)


# ---------------------------------------------------------------------------
# Kernel 1: fused QKV projection -> (B, H, T, D) x 3, scale folded into q.
# ---------------------------------------------------------------------------
def _qkv_proj_kernel(x_ref, wq_ref, bq_ref, wk_ref, bk_ref, wv_ref, bv_ref,
                     q_ref, k_ref, v_ref, *, n_head: int):
    # x_ref: (1, TT, C); w*: (C, C); b*: (1, C); outputs: (1, H, TT, D)
    TT, C = x_ref.shape[1], x_ref.shape[2]
    H = n_head
    D = C // H
    x = x_ref[0]                                                       # (TT, C)

    def proj(w_ref, b_ref, out_ref):
        y = jnp.dot(x, w_ref[...], preferred_element_type=jnp.float32)
        y = y + b_ref[0].astype(jnp.float32)
        # (TT, C) -> (H, TT, D); done once per sequence tile, NOT per kv step.
        out_ref[0] = jnp.swapaxes(y.reshape(TT, H, D), 0, 1).astype(out_ref.dtype)

    proj(wq_ref, bq_ref, q_ref)
    proj(wk_ref, bk_ref, k_ref)
    proj(wv_ref, bv_ref, v_ref)


# ---------------------------------------------------------------------------
# Kernel 2: flash attention (online softmax) + output projection.
# ---------------------------------------------------------------------------
def _flash_attn_kernel(q_ref, k_ref, v_ref, wproj_ref, bproj_ref, o_ref):
    # q_ref:   (1, H, TQ, D)  pre-scaled query tile
    # k/v_ref: (1, H, T, D)   full-sequence K/V (resident across q tiles)
    # wproj_ref: (C, C), bproj_ref: (1, C), o_ref: (1, TQ, C)
    qi = pl.program_id(1)
    H, TQ, D = q_ref.shape[1], q_ref.shape[2], q_ref.shape[3]
    TK = TQ                      # kv tile size == q tile size
    C = H * D
    dtype = k_ref.dtype

    q = q_ref[0]                                                       # (H, TQ, D)
    neg = jnp.float32(-1e30)     # finite mask value: never NaNs

    def kv_step(kj, carry, *, masked: bool):
        m, l, acc = carry
        k_start = pl.multiple_of(kj * TK, TK)
        k = k_ref[0, :, pl.ds(k_start, TK), :]                         # (H, TK, D)
        v = v_ref[0, :, pl.ds(k_start, TK), :]                         # (H, TK, D)

        # All heads at once; contraction over the native last dim (no k.T).
        s = jnp.einsum('hqd,hkd->hqk', q, k,
                       preferred_element_type=jnp.float32)             # (H, TQ, TK)
        if masked:  # only the diagonal tile pays for iota/compare/select
            q_pos = qi * TQ + jax.lax.broadcasted_iota(jnp.int32, (TQ, TK), 0)
            k_pos = k_start + jax.lax.broadcasted_iota(jnp.int32, (TQ, TK), 1)
            s = jnp.where((q_pos >= k_pos)[None, :, :], s, neg)

        # online softmax update (state always f32)
        m_new = jnp.maximum(m, jnp.max(s, axis=-1, keepdims=True))
        alpha = jnp.exp(m - m_new)
        p = jnp.exp(s - m_new)
        l_new = alpha * l + jnp.sum(p, axis=-1, keepdims=True)
        acc_new = alpha * acc + jnp.einsum('hqk,hkd->hqd', p.astype(dtype), v,
                                           preferred_element_type=jnp.float32)
        return m_new, l_new, acc_new

    m0 = jnp.full((H, TQ, 1), neg, dtype=jnp.float32)
    l0 = jnp.zeros((H, TQ, 1), dtype=jnp.float32)
    a0 = jnp.zeros((H, TQ, D), dtype=jnp.float32)

    # causality: q tile qi sees kv tiles 0..qi; tiles 0..qi-1 need no mask.
    carry = jax.lax.fori_loop(0, qi, functools.partial(kv_step, masked=False),
                              (m0, l0, a0))
    m, l, acc = kv_step(qi, carry, masked=True)

    # exact reciprocal: a single (H,TQ,1) normalize per grid step is not the
    # bottleneck and keeps accuracy tight.
    y = acc * pl.reciprocal(l, approx=False)                           # (H, TQ, D)
    y = jnp.swapaxes(y, 0, 1).reshape(TQ, C).astype(dtype)             # (TQ, C)

    out = jnp.dot(y, wproj_ref[...], preferred_element_type=jnp.float32)
    out = out + bproj_ref[0].astype(jnp.float32)
    o_ref[0] = out.astype(o_ref.dtype)


def causal_self_attention(x, w_qkv, b_qkv, w_proj, b_proj, *, n_head,
                          idx_layer=0, scale_attn_by_inverse_layer_idx=False,
                          q_tile=None, single_buffer_constants=True):
    """x: (B, T, C). Weights in (in, out) layout: w_qkv (C, 3C), w_proj (C, C);
    biases (1, 3C) / (1, C)."""
    B, T, C = x.shape
    assert C % n_head == 0
    H = n_head
    D = C // H

    scale = 1.0 / math.sqrt(D)
    if scale_attn_by_inverse_layer_idx:
        scale = scale / float(idx_layer + 1)

    if q_tile is None:
        # 256 fills the 256-wide MXU on v6e/v7x; pass q_tile=128 on v5e.
        q_tile = next((c for c in (256, 128) if T % c == 0), T)
    assert T % q_tile == 0, "T must be divisible by the q tile size"
    n_q = T // q_tile

    b_qkv = jnp.reshape(b_qkv, (1, 3 * C))
    b_proj = jnp.reshape(b_proj, (1, C))

    # Pre-split c_attn into q/k/v projections; fold attention scale into q.
    w_q = w_qkv[:, 0 * C:1 * C] * scale
    w_k = w_qkv[:, 1 * C:2 * C]
    w_v = w_qkv[:, 2 * C:3 * C]
    b_q = b_qkv[:, 0 * C:1 * C] * scale
    b_k = b_qkv[:, 1 * C:2 * C]
    b_v = b_qkv[:, 2 * C:3 * C]

    vmem_limit = _vmem_limit_bytes()
    itemsize = x.dtype.itemsize

    def run(buffered: bool):
        # Single-buffer blocks whose index never changes (weights/biases) or
        # only changes along the batch axis (K/V): halves their VMEM footprint.
        pm = {"pipeline_mode": pl.Buffered(1)} if buffered else {}

        # ---- kernel 1: fused QKV projection ----
        wspec = pl.BlockSpec((C, C), lambda b, t: (0, 0), **pm)
        bspec = pl.BlockSpec((1, C), lambda b, t: (0, 0), **pm)
        qkv_shape = jax.ShapeDtypeStruct((B, H, T, D), x.dtype)
        qkv_out_spec = pl.BlockSpec((1, H, q_tile, D), lambda b, t: (b, 0, t, 0))

        q_hd, k_hd, v_hd = pl.pallas_call(
            functools.partial(_qkv_proj_kernel, n_head=H),
            out_shape=(qkv_shape, qkv_shape, qkv_shape),
            grid_spec=pltpu.PrefetchScalarGridSpec(
                num_scalar_prefetch=0,
                grid=(B, n_q),
                in_specs=[
                    pl.BlockSpec((1, q_tile, C), lambda b, t: (b, t, 0)),
                    wspec, bspec,    # q projection (pre-scaled)
                    wspec, bspec,    # k projection
                    wspec, bspec,    # v projection
                ],
                out_specs=[qkv_out_spec, qkv_out_spec, qkv_out_spec],
            ),
            compiler_params=pltpu.CompilerParams(
                dimension_semantics=("parallel", "parallel"),
                vmem_limit_bytes=vmem_limit,
            ),
            cost_estimate=pl.CostEstimate(
                flops=int(2 * B * T * C * 3 * C),
                transcendentals=0,
                bytes_accessed=int((4 * B * T * C + 3 * C * C + 3 * C) * itemsize),
            ),
        )(x, w_q, b_q, w_k, b_k, w_v, b_v)

        # ---- kernel 2: flash attention + output projection ----
        # K/V and W_proj blocks are resident across the q-tile axis (their
        # block index only depends on b), so they are DMA'd once per batch elem.
        kvspec = pl.BlockSpec((1, H, T, D), lambda b, qi: (b, 0, 0, 0), **pm)
        wpspec = pl.BlockSpec((C, C), lambda b, qi: (0, 0), **pm)
        bpspec = pl.BlockSpec((1, C), lambda b, qi: (0, 0), **pm)
        # TODO(synk): for very long T on v7x (full K/V block > VMEM even
        # single-buffered), keep K/V in HBM via memory_space=pl.ANY and manually
        # double-buffer (H, TK, D) tiles with pltpu.make_async_copy.

        t_eff = 0.5 * (T + q_tile)          # mean causal kv length per query
        attn_flops = int(2 * B * H * T * t_eff * D * 2 + 2 * B * T * C * C)
        attn_trans = int(B * H * T * t_eff)
        attn_bytes = int((4 * B * T * C + C * C + C) * itemsize)

        return pl.pallas_call(
            _flash_attn_kernel,
            out_shape=jax.ShapeDtypeStruct((B, T, C), x.dtype),
            grid_spec=pltpu.PrefetchScalarGridSpec(
                num_scalar_prefetch=0,
                grid=(B, n_q),
                in_specs=[
                    pl.BlockSpec((1, H, q_tile, D), lambda b, qi: (b, 0, qi, 0)),
                    kvspec,          # k
                    kvspec,          # v
                    wpspec, bpspec,  # output projection
                ],
                out_specs=pl.BlockSpec((1, q_tile, C), lambda b, qi: (b, qi, 0)),
            ),
            compiler_params=pltpu.CompilerParams(
                dimension_semantics=("parallel", "parallel"),
                vmem_limit_bytes=vmem_limit,
            ),
            cost_estimate=pl.CostEstimate(
                flops=attn_flops,
                transcendentals=attn_trans,
                bytes_accessed=attn_bytes,
            ),
        )(q_hd, k_hd, v_hd, w_proj, b_proj)

    if single_buffer_constants:
        try:
            return run(True)
        except Exception:
            # pipeline_mode=pl.Buffered(1) not accepted by this JAX build;
            # fall back to default double buffering (correctness unaffected).
            return run(False)
    return run(False)


def _reference(x, w_qkv, b_qkv, w_proj, b_proj, n_head, scale):
    # plain-JAX reference mirroring the PyTorch forward
    B, T, C = x.shape
    D = C // n_head
    qkv = x @ w_qkv + b_qkv
    q, k, v = jnp.split(qkv, 3, axis=-1)
    q = q.reshape(B, T, n_head, D).transpose(0, 2, 1, 3)
    k = k.reshape(B, T, n_head, D).transpose(0, 2, 1, 3)
    v = v.reshape(B, T, n_head, D).transpose(0, 2, 1, 3)
    att = jnp.einsum("bhqd,bhkd->bhqk", q, k) * scale
    mask = jnp.tril(jnp.ones((T, T), dtype=bool))
    att = jnp.where(mask[None, None], att, -jnp.inf)
    att = jax.nn.softmax(att, axis=-1)
    y = jnp.einsum("bhqk,bhkd->bhqd", att, v)
    y = y.transpose(0, 2, 1, 3).reshape(B, T, C)
    return y @ w_proj + b_proj


if __name__ == "__main__":
    # config: n_embd=32, n_head=4, block_size >= T, dropout=0.0, bias=True,
    #         scale_attn_by_inverse_layer_idx=True, idx_layer=1
    B, T, C = 2, 8, 32
    n_head = 4
    idx_layer = 1
    scale_by_layer = True

    key = jax.random.PRNGKey(0)
    kx, k1, k2, k3, k4 = jax.random.split(key, 5)

    x = jax.random.normal(kx, (B, T, C), dtype=jnp.float32)

    # PyTorch nn.Linear init: U(-1/sqrt(fan_in), 1/sqrt(fan_in)), deterministic here.
    lim = 1.0 / math.sqrt(C)
    w_qkv = jax.random.uniform(k1, (C, 3 * C), minval=-lim, maxval=lim, dtype=jnp.float32)
    b_qkv = jax.random.uniform(k2, (1, 3 * C), minval=-lim, maxval=lim, dtype=jnp.float32)
    w_proj = jax.random.uniform(k3, (C, C), minval=-lim, maxval=lim, dtype=jnp.float32)
    b_proj = jax.random.uniform(k4, (1, C), minval=-lim, maxval=lim, dtype=jnp.float32)

    out = causal_self_attention(
        x, w_qkv, b_qkv, w_proj, b_proj,
        n_head=n_head, idx_layer=idx_layer,
        scale_attn_by_inverse_layer_idx=scale_by_layer)
    out = jax.block_until_ready(out)

    scale = 1.0 / math.sqrt(C // n_head) / float(idx_layer + 1)
    ref = _reference(x, w_qkv, b_qkv[0], w_proj, b_proj[0], n_head, scale)
    assert out.shape == (B, T, C)
    assert jnp.allclose(out, ref, atol=2e-3, rtol=2e-3), "mismatch vs reference"
    print("KERNEL_OK")
</pallas_src>

<mosaic_0001>
module attributes {stable_mosaic.version = 11 : i64} {
  func.func @_qkv_proj_kernel(%arg0: i32, %arg1: i32, %arg2: memref<1x8x32xf32, #tpu.memory_space<vmem>>, %arg3: memref<32x32xf32, #tpu.memory_space<vmem>>, %arg4: memref<1x32xf32, #tpu.memory_space<vmem>>, %arg5: memref<32x32xf32, #tpu.memory_space<vmem>>, %arg6: memref<1x32xf32, #tpu.memory_space<vmem>>, %arg7: memref<32x32xf32, #tpu.memory_space<vmem>>, %arg8: memref<1x32xf32, #tpu.memory_space<vmem>>, %arg9: memref<1x4x8x8xf32, #tpu.memory_space<vmem>>, %arg10: memref<1x4x8x8xf32, #tpu.memory_space<vmem>>, %arg11: memref<1x4x8x8xf32, #tpu.memory_space<vmem>>) attributes {dimension_semantics = [#tpu.dimension_semantics<parallel>, #tpu.dimension_semantics<parallel>], iteration_bounds = array<i64: 2, 1>, scalar_prefetch = 0 : i64, scratch_operands = 0 : i64, tpu.core_type = #tpu.core_type<tc>, window_params = [{transform_indices = @transform_0, window_bounds = array<i64: 1, 8, 32>}, {pipeline_mode = #tpu.pipeline_mode<synchronous>, transform_indices = @transform_1, window_bounds = array<i64: 32, 32>}, {pipeline_mode = #tpu.pipeline_mode<synchronous>, transform_indices = @transform_2, window_bounds = array<i64: 1, 32>}, {pipeline_mode = #tpu.pipeline_mode<synchronous>, transform_indices = @transform_3, window_bounds = array<i64: 32, 32>}, {pipeline_mode = #tpu.pipeline_mode<synchronous>, transform_indices = @transform_4, window_bounds = array<i64: 1, 32>}, {pipeline_mode = #tpu.pipeline_mode<synchronous>, transform_indices = @transform_5, window_bounds = array<i64: 32, 32>}, {pipeline_mode = #tpu.pipeline_mode<synchronous>, transform_indices = @transform_6, window_bounds = array<i64: 1, 32>}, {transform_indices = @transform_7, window_bounds = array<i64: 1, 4, 8, 8>}, {transform_indices = @transform_8, window_bounds = array<i64: 1, 4, 8, 8>}, {transform_indices = @transform_9, window_bounds = array<i64: 1, 4, 8, 8>}]} {
    %c0 = arith.constant 0 : index
    %c0_0 = arith.constant 0 : index
    %c0_1 = arith.constant 0 : index
    %0 = vector.load %arg2[%c0, %c0_0, %c0_1] : memref<1x8x32xf32, #tpu.memory_space<vmem>>, vector<1x8x32xf32>
    %1 = vector.shape_cast %0 : vector<1x8x32xf32> to vector<8x32xf32>
    %c0_2 = arith.constant 0 : index
    %c0_3 = arith.constant 0 : index
    %2 = vector.load %arg3[%c0_2, %c0_3] : memref<32x32xf32, #tpu.memory_space<vmem>>, vector<32x32xf32>
    %cst = arith.constant dense<0.000000e+00> : vector<8x32xf32>
    %3 = tpu.matmul %1, %2, %cst {dimension_numbers = #tpu.dot_dimension_numbers<[1], [0], [0], [1], [0, 0, 1, 1], [], []>} : vector<8x32xf32>, vector<32x32xf32>, vector<8x32xf32> -> vector<8x32xf32>
    %c0_4 = arith.constant 0 : index
    %c0_5 = arith.constant 0 : index
    %4 = vector.load %arg4[%c0_4, %c0_5] : memref<1x32xf32, #tpu.memory_space<vmem>>, vector<1x32xf32>
    %5 = vector.shape_cast %4 : vector<1x32xf32> to vector<32xf32>
    %6 = vector.shape_cast %5 : vector<32xf32> to vector<1x32xf32>
    %7 = vector.broadcast %6 : vector<1x32xf32> to vector<8x32xf32>
    %8 = arith.addf %3, %7 : vector<8x32xf32>
    %9 = vector.shape_cast %8 : vector<8x32xf32> to vector<8x4x8xf32>
    %10 = tpu.transpose %9, [1, 0, 2] : vector<8x4x8xf32> -> vector<4x8x8xf32>
    %c0_6 = arith.constant 0 : index
    %c0_7 = arith.constant 0 : index
    %c0_8 = arith.constant 0 : index
    %c0_9 = arith.constant 0 : index
    %11 = vector.load %arg9[%c0_6, %c0_7, %c0_8, %c0_9] : memref<1x4x8x8xf32, #tpu.memory_space<vmem>>, vector<1x4x8x8xf32>
    %12 = vector.shape_cast %11 : vector<1x4x8x8xf32> to vector<4x8x8xf32>
    %13 = vector.shape_cast %10 : vector<4x8x8xf32> to vector<1x4x8x8xf32>
    tpu.vector_store %arg9[%c0_6, %c0_7, %c0_8, %c0_9], %13 {strides = array<i32>} : memref<1x4x8x8xf32, #tpu.memory_space<vmem>>, vector<1x4x8x8xf32>,
    %c0_10 = arith.constant 0 : index
    %c0_11 = arith.constant 0 : index
    %14 = vector.load %arg5[%c0_10, %c0_11] : memref<32x32xf32, #tpu.memory_space<vmem>>, vector<32x32xf32>
    %cst_12 = arith.constant dense<0.000000e+00> : vector<8x32xf32>
    %15 = tpu.matmul %1, %14, %cst_12 {dimension_numbers = #tpu.dot_dimension_numbers<[1], [0], [0], [1], [0, 0, 1, 1], [], []>} : vector<8x32xf32>, vector<32x32xf32>, vector<8x32xf32> -> vector<8x32xf32>
    %c0_13 = arith.constant 0 : index
    %c0_14 = arith.constant 0 : index
    %16 = vector.load %arg6[%c0_13, %c0_14] : memref<1x32xf32, #tpu.memory_space<vmem>>, vector<1x32xf32>
    %17 = vector.shape_cast %16 : vector<1x32xf32> to vector<32xf32>
    %18 = vector.shape_cast %17 : vector<32xf32> to vector<1x32xf32>
    %19 = vector.broadcast %18 : vector<1x32xf32> to vector<8x32xf32>
    %20 = arith.addf %15, %19 : vector<8x32xf32>
    %21 = vector.shape_cast %20 : vector<8x32xf32> to vector<8x4x8xf32>
    %22 = tpu.transpose %21, [1, 0, 2] : vector<8x4x8xf32> -> vector<4x8x8xf32>
    %c0_15 = arith.constant 0 : index
    %c0_16 = arith.constant 0 : index
    %c0_17 = arith.constant 0 : index
    %c0_18 = arith.constant 0 : index
    %23 = vector.load %arg10[%c0_15, %c0_16, %c0_17, %c0_18] : memref<1x4x8x8xf32, #tpu.memory_space<vmem>>, vector<1x4x8x8xf32>
    %24 = vector.shape_cast %23 : vector<1x4x8x8xf32> to vector<4x8x8xf32>
    %25 = vector.shape_cast %22 : vector<4x8x8xf32> to vector<1x4x8x8xf32>
    tpu.vector_store %arg10[%c0_15, %c0_16, %c0_17, %c0_18], %25 {strides = array<i32>} : memref<1x4x8x8xf32, #tpu.memory_space<vmem>>, vector<1x4x8x8xf32>,
    %c0_19 = arith.constant 0 : index
    %c0_20 = arith.constant 0 : index
    %26 = vector.load %arg7[%c0_19, %c0_20] : memref<32x32xf32, #tpu.memory_space<vmem>>, vector<32x32xf32>
    %cst_21 = arith.constant dense<0.000000e+00> : vector<8x32xf32>
    %27 = tpu.matmul %1, %26, %cst_21 {dimension_numbers = #tpu.dot_dimension_numbers<[1], [0], [0], [1], [0, 0, 1, 1], [], []>} : vector<8x32xf32>, vector<32x32xf32>, vector<8x32xf32> -> vector<8x32xf32>
    %c0_22 = arith.constant 0 : index
    %c0_23 = arith.constant 0 : index
    %28 = vector.load %arg8[%c0_22, %c0_23] : memref<1x32xf32, #tpu.memory_space<vmem>>, vector<1x32xf32>
    %29 = vector.shape_cast %28 : vector<1x32xf32> to vector<32xf32>
    %30 = vector.shape_cast %29 : vector<32xf32> to vector<1x32xf32>
    %31 = vector.broadcast %30 : vector<1x32xf32> to vector<8x32xf32>
    %32 = arith.addf %27, %31 : vector<8x32xf32>
    %33 = vector.shape_cast %32 : vector<8x32xf32> to vector<8x4x8xf32>
    %34 = tpu.transpose %33, [1, 0, 2] : vector<8x4x8xf32> -> vector<4x8x8xf32>
    %c0_24 = arith.constant 0 : index
    %c0_25 = arith.constant 0 : index
    %c0_26 = arith.constant 0 : index
    %c0_27 = arith.constant 0 : index
    %35 = vector.load %arg11[%c0_24, %c0_25, %c0_26, %c0_27] : memref<1x4x8x8xf32, #tpu.memory_space<vmem>>, vector<1x4x8x8xf32>
    %36 = vector.shape_cast %35 : vector<1x4x8x8xf32> to vector<4x8x8xf32>
    %37 = vector.shape_cast %34 : vector<4x8x8xf32> to vector<1x4x8x8xf32>
    tpu.vector_store %arg11[%c0_24, %c0_25, %c0_26, %c0_27], %37 {strides = array<i32>} : memref<1x4x8x8xf32, #tpu.memory_space<vmem>>, vector<1x4x8x8xf32>,
    return
  }
  func.func @transform_0(%arg0: i32, %arg1: i32) -> (i32, i32, i32) {
    %c0_i32 = arith.constant 0 : i32
    %c0_i32_0 = arith.constant 0 : i32
    return %arg0, %arg1, %c0_i32 : i32, i32, i32
  }
  func.func @transform_1(%arg0: i32, %arg1: i32) -> (i32, i32) {
    %c0_i32 = arith.constant 0 : i32
    %c0_i32_0 = arith.constant 0 : i32
    %c0_i32_1 = arith.constant 0 : i32
    return %c0_i32, %c0_i32_0 : i32, i32
  }
  func.func @transform_2(%arg0: i32, %arg1: i32) -> (i32, i32) {
    %c0_i32 = arith.constant 0 : i32
    %c0_i32_0 = arith.constant 0 : i32
    %c0_i32_1 = arith.constant 0 : i32
    return %c0_i32, %c0_i32_0 : i32, i32
  }
  func.func @transform_3(%arg0: i32, %arg1: i32) -> (i32, i32) {
    %c0_i32 = arith.constant 0 : i32
    %c0_i32_0 = arith.constant 0 : i32
    %c0_i32_1 = arith.constant 0 : i32
    return %c0_i32, %c0_i32_0 : i32, i32
  }
  func.func @transform_4(%arg0: i32, %arg1: i32) -> (i32, i32) {
    %c0_i32 = arith.constant 0 : i32
    %c0_i32_0 = arith.constant 0 : i32
    %c0_i32_1 = arith.constant 0 : i32
    return %c0_i32, %c0_i32_0 : i32, i32
  }
  func.func @transform_5(%arg0: i32, %arg1: i32) -> (i32, i32) {
    %c0_i32 = arith.constant 0 : i32
    %c0_i32_0 = arith.constant 0 : i32
    %c0_i32_1 = arith.constant 0 : i32
    return %c0_i32, %c0_i32_0 : i32, i32
  }
  func.func @transform_6(%arg0: i32, %arg1: i32) -> (i32, i32) {
    %c0_i32 = arith.constant 0 : i32
    %c0_i32_0 = arith.constant 0 : i32
    %c0_i32_1 = arith.constant 0 : i32
    return %c0_i32, %c0_i32_0 : i32, i32
  }
  func.func @transform_7(%arg0: i32, %arg1: i32) -> (i32, i32, i32, i32) {
    %c0_i32 = arith.constant 0 : i32
    %c0_i32_0 = arith.constant 0 : i32
    %c0_i32_1 = arith.constant 0 : i32
    return %arg0, %c0_i32, %arg1, %c0_i32_0 : i32, i32, i32, i32
  }
  func.func @transform_8(%arg0: i32, %arg1: i32) -> (i32, i32, i32, i32) {
    %c0_i32 = arith.constant 0 : i32
    %c0_i32_0 = arith.constant 0 : i32
    %c0_i32_1 = arith.constant 0 : i32
    return %arg0, %c0_i32, %arg1, %c0_i32_0 : i32, i32, i32, i32
  }
  func.func @transform_9(%arg0: i32, %arg1: i32) -> (i32, i32, i32, i32) {
    %c0_i32 = arith.constant 0 : i32
    %c0_i32_0 = arith.constant 0 : i32
    %c0_i32_1 = arith.constant 0 : i32
    return %arg0, %c0_i32, %arg1, %c0_i32_0 : i32, i32, i32, i32
  }
}

module attributes {stable_mosaic.version = 11 : i64} {
  func.func @_qkv_proj_kernel(%arg0: i32, %arg1: i32, %arg2: memref<1x8x32xf32, #tpu.memory_space<vmem>>, %arg3: memref<32x32xf32, #tpu.memory_space<vmem>>, %arg4: memref<1x32xf32, #tpu.memory_space<vmem>>, %arg5: memref<32x32xf32, #tpu.memory_space<vmem>>, %arg6: memref<1x32xf32, #tpu.memory_space<vmem>>, %arg7: memref<32x32xf32, #tpu.memory_space<vmem>>, %arg8: memref<1x32xf32, #tpu.memory_space<vmem>>, %arg9: memref<1x4x8x8xf32, #tpu.memory_space<vmem>>, %arg10: memref<1x4x8x8xf32, #tpu.memory_space<vmem>>, %arg11: memref<1x4x8x8xf32, #tpu.memory_space<vmem>>) attributes {dimension_semantics = [#tpu.dimension_semantics<parallel>, #tpu.dimension_semantics<parallel>], iteration_bounds = array<i64: 2, 1>, scalar_prefetch = 0 : i64, scratch_operands = 0 : i64, tpu.core_type = #tpu.core_type<tc>, window_params = [{transform_indices = @transform_0, window_bounds = array<i64: 1, 8, 32>}, {pipeline_mode = #tpu.pipeline_mode<synchronous>, transform_indices = @transform_1, window_bounds = array<i64: 32, 32>}, {pipeline_mode = #tpu.pipeline_mode<synchronous>, transform_indices = @transform_2, window_bounds = array<i64: 1, 32>}, {pipeline_mode = #tpu.pipeline_mode<synchronous>, transform_indices = @transform_3, window_bounds = array<i64: 32, 32>}, {pipeline_mode = #tpu.pipeline_mode<synchronous>, transform_indices = @transform_4, window_bounds = array<i64: 1, 32>}, {pipeline_mode = #tpu.pipeline_mode<synchronous>, transform_indices = @transform_5, window_bounds = array<i64: 32, 32>}, {pipeline_mode = #tpu.pipeline_mode<synchronous>, transform_indices = @transform_6, window_bounds = array<i64: 1, 32>}, {transform_indices = @transform_7, window_bounds = array<i64: 1, 4, 8, 8>}, {transform_indices = @transform_8, window_bounds = array<i64: 1, 4, 8, 8>}, {transform_indices = @transform_9, window_bounds = array<i64: 1, 4, 8, 8>}]} {
    %c0 = arith.constant 0 : index
    %c0_0 = arith.constant 0 : index
    %c0_1 = arith.constant 0 : index
    %0 = vector.load %arg2[%c0, %c0_0, %c0_1] : memref<1x8x32xf32, #tpu.memory_space<vmem>>, vector<1x8x32xf32>
    %1 = vector.shape_cast %0 : vector<1x8x32xf32> to vector<8x32xf32>
    %c0_2 = arith.constant 0 : index
    %c0_3 = arith.constant 0 : index
    %2 = vector.load %arg3[%c0_2, %c0_3] : memref<32x32xf32, #tpu.memory_space<vmem>>, vector<32x32xf32>
    %cst = arith.constant dense<0.000000e+00> : vector<8x32xf32>
    %3 = tpu.matmul %1, %2, %cst {dimension_numbers = #tpu.dot_dimension_numbers<[1], [0], [0], [1], [0, 0, 1, 1], [], []>} : vector<8x32xf32>, vector<32x32xf32>, vector<8x32xf32> -> vector<8x32xf32>
    %c0_4 = arith.constant 0 : index
    %c0_5 = arith.constant 0 : index
    %4 = vector.load %arg4[%c0_4, %c0_5] : memref<1x32xf32, #tpu.memory_space<vmem>>, vector<1x32xf32>
    %5 = vector.shape_cast %4 : vector<1x32xf32> to vector<32xf32>
    %6 = vector.shape_cast %5 : vector<32xf32> to vector<1x32xf32>
    %7 = vector.broadcast %6 : vector<1x32xf32> to vector<8x32xf32>
    %8 = arith.addf %3, %7 : vector<8x32xf32>
    %9 = vector.shape_cast %8 : vector<8x32xf32> to vector<8x4x8xf32>
    %10 = tpu.transpose %9, [1, 0, 2] : vector<8x4x8xf32> -> vector<4x8x8xf32>
    %c0_6 = arith.constant 0 : index
    %c0_7 = arith.constant 0 : index
    %c0_8 = arith.constant 0 : index
    %c0_9 = arith.constant 0 : index
    %11 = vector.load %arg9[%c0_6, %c0_7, %c0_8, %c0_9] : memref<1x4x8x8xf32, #tpu.memory_space<vmem>>, vector<1x4x8x8xf32>
    %12 = vector.shape_cast %11 : vector<1x4x8x8xf32> to vector<4x8x8xf32>
    %13 = vector.shape_cast %10 : vector<4x8x8xf32> to vector<1x4x8x8xf32>
    tpu.vector_store %arg9[%c0_6, %c0_7, %c0_8, %c0_9], %13 {strides = array<i32>} : memref<1x4x8x8xf32, #tpu.memory_space<vmem>>, vector<1x4x8x8xf32>,
    %c0_10 = arith.constant 0 : index
    %c0_11 = arith.constant 0 : index
    %14 = vector.load %arg5[%c0_10, %c0_11] : memref<32x32xf32, #tpu.memory_space<vmem>>, vector<32x32xf32>
    %cst_12 = arith.constant dense<0.000000e+00> : vector<8x32xf32>
    %15 = tpu.matmul %1, %14, %cst_12 {dimension_numbers = #tpu.dot_dimension_numbers<[1], [0], [0], [1], [0, 0, 1, 1], [], []>} : vector<8x32xf32>, vector<32x32xf32>, vector<8x32xf32> -> vector<8x32xf32>
    %c0_13 = arith.constant 0 : index
    %c0_14 = arith.constant 0 : index
    %16 = vector.load %arg6[%c0_13, %c0_14] : memref<1x32xf32, #tpu.memory_space<vmem>>, vector<1x32xf32>
    %17 = vector.shape_cast %16 : vector<1x32xf32> to vector<32xf32>
    %18 = vector.shape_cast %17 : vector<32xf32> to vector<1x32xf32>
    %19 = vector.broadcast %18 : vector<1x32xf32> to vector<8x32xf32>
    %20 = arith.addf %15, %19 : vector<8x32xf32>
    %21 = vector.shape_cast %20 : vector<8x32xf32> to vector<8x4x8xf32>
    %22 = tpu.transpose %21, [1, 0, 2] : vector<8x4x8xf32> -> vector<4x8x8xf32>
    %c0_15 = arith.constant 0 : index
    %c0_16 = arith.constant 0 : index
    %c0_17 = arith.constant 0 : index
    %c0_18 = arith.constant 0 : index
    %23 = vector.load %arg10[%c0_15, %c0_16, %c0_17, %c0_18] : memref<1x4x8x8xf32, #tpu.memory_space<vmem>>, vector<1x4x8x8xf32>
    %24 = vector.shape_cast %23 : vector<1x4x8x8xf32> to vector<4x8x8xf32>
    %25 = vector.shape_cast %22 : vector<4x8x8xf32> to vector<1x4x8x8xf32>
    tpu.vector_store %arg10[%c0_15, %c0_16, %c0_17, %c0_18], %25 {strides = array<i32>} : memref<1x4x8x8xf32, #tpu.memory_space<vmem>>, vector<1x4x8x8xf32>,
    %c0_19 = arith.constant 0 : index
    %c0_20 = arith.constant 0 : index
    %26 = vector.load %arg7[%c0_19, %c0_20] : memref<32x32xf32, #tpu.memory_space<vmem>>, vector<32x32xf32>
    %cst_21 = arith.constant dense<0.000000e+00> : vector<8x32xf32>
    %27 = tpu.matmul %1, %26, %cst_21 {dimension_numbers = #tpu.dot_dimension_numbers<[1], [0], [0], [1], [0, 0, 1, 1], [], []>} : vector<8x32xf32>, vector<32x32xf32>, vector<8x32xf32> -> vector<8x32xf32>
    %c0_22 = arith.constant 0 : index
    %c0_23 = arith.constant 0 : index
    %28 = vector.load %arg8[%c0_22, %c0_23] : memref<1x32xf32, #tpu.memory_space<vmem>>, vector<1x32xf32>
    %29 = vector.shape_cast %28 : vector<1x32xf32> to vector<32xf32>
    %30 = vector.shape_cast %29 : vector<32xf32> to vector<1x32xf32>
    %31 = vector.broadcast %30 : vector<1x32xf32> to vector<8x32xf32>
    %32 = arith.addf %27, %31 : vector<8x32xf32>
    %33 = vector.shape_cast %32 : vector<8x32xf32> to vector<8x4x8xf32>
    %34 = tpu.transpose %33, [1, 0, 2] : vector<8x4x8xf32> -> vector<4x8x8xf32>
    %c0_24 = arith.constant 0 : index
    %c0_25 = arith.constant 0 : index
    %c0_26 = arith.constant 0 : index
    %c0_27 = arith.constant 0 : index
    %35 = vector.load %arg11[%c0_24, %c0_25, %c0_26, %c0_27] : memref<1x4x8x8xf32, #tpu.memory_space<vmem>>, vector<1x4x8x8xf32>
    %36 = vector.shape_cast %35 : vector<1x4x8x8xf32> to vector<4x8x8xf32>
    %37 = vector.shape_cast %34 : vector<4x8x8xf32> to vector<1x4x8x8xf32>
    tpu.vector_store %arg11[%c0_24, %c0_25, %c0_26, %c0_27], %37 {strides = array<i32>} : memref<1x4x8x8xf32, #tpu.memory_space<vmem>>, vector<1x4x8x8xf32>,
    return
  }
  func.func @transform_0(%arg0: i32, %arg1: i32) -> (i32, i32, i32) {
    %c0_i32 = arith.constant 0 : i32
    %c0_i32_0 = arith.constant 0 : i32
    return %arg0, %arg1, %c0_i32 : i32, i32, i32
  }
  func.func @transform_1(%arg0: i32, %arg1: i32) -> (i32, i32) {
    %c0_i32 = arith.constant 0 : i32
    %c0_i32_0 = arith.constant 0 : i32
    %c0_i32_1 = arith.constant 0 : i32
    return %c0_i32, %c0_i32_0 : i32, i32
  }
  func.func @transform_2(%arg0: i32, %arg1: i32) -> (i32, i32) {
    %c0_i32 = arith.constant 0 : i32
    %c0_i32_0 = arith.constant 0 : i32
    %c0_i32_1 = arith.constant 0 : i32
    return %c0_i32, %c0_i32_0 : i32, i32
  }
  func.func @transform_3(%arg0: i32, %arg1: i32) -> (i32, i32) {
    %c0_i32 = arith.constant 0 : i32
    %c0_i32_0 = arith.constant 0 : i32
    %c0_i32_1 = arith.constant 0 : i32
    return %c0_i32, %c0_i32_0 : i32, i32
  }
  func.func @transform_4(%arg0: i32, %arg1: i32) -> (i32, i32) {
    %c0_i32 = arith.constant 0 : i32
    %c0_i32_0 = arith.constant 0 : i32
    %c0_i32_1 = arith.constant 0 : i32
    return %c0_i32, %c0_i32_0 : i32, i32
  }
  func.func @transform_5(%arg0: i32, %arg1: i32) -> (i32, i32) {
    %c0_i32 = arith.constant 0 : i32
    %c0_i32_0 = arith.constant 0 : i32
    %c0_i32_1 = arith.constant 0 : i32
    return %c0_i32, %c0_i32_0 : i32, i32
  }
  func.func @transform_6(%arg0: i32, %arg1: i32) -> (i32, i32) {
    %c0_i32 = arith.constant 0 : i32
    %c0_i32_0 = arith.constant 0 : i32
    %c0_i32_1 = arith.constant 0 : i32
    return %c0_i32, %c0_i32_0 : i32, i32
  }
  func.func @transform_7(%arg0: i32, %arg1: i32) -> (i32, i32, i32, i32) {
    %c0_i32 = arith.constant 0 : i32
    %c0_i32_0 = arith.constant 0 : i32
    %c0_i32_1 = arith.constant 0 : i32
    return %arg0, %c0_i32, %arg1, %c0_i32_0 : i32, i32, i32, i32
  }
  func.func @transform_8(%arg0: i32, %arg1: i32) -> (i32, i32, i32, i32) {
    %c0_i32 = arith.constant 0 : i32
    %c0_i32_0 = arith.constant 0 : i32
    %c0_i32_1 = arith.constant 0 : i32
    return %arg0, %c0_i32, %arg1, %c0_i32_0 : i32, i32, i32, i32
  }
  func.func @transform_9(%arg0: i32, %arg1: i32) -> (i32, i32, i32, i32) {
    %c0_i32 = arith.constant 0 : i32
    %c0_i32_0 = arith.constant 0 : i32
    %c0_i32_1 = arith.constant 0 : i32
    return %arg0, %c0_i32, %arg1, %c0_i32_0 : i32, i32, i32, i32
  }
}

</mosaic_0001>

<bundles_post_ra>
// kernel: tpu_custom_call.1
= control target key start
LH: loop header
LB: loop body
LE: loop exit
PB: predicated region body
PF: predicated region fallthrough
CT: control target
= control target key end

     0   :  { %s2394_s0 = inlined_call_operand.hbm [shape: f32[2,8,32], index: 0, kind: input, shape index: {}]   ;;  %s2395_s1 = inlined_call_operand.hbm [shape: f32[32,32], index: 1, kind: input, shape index: {}]   ;;  %s2396_s2 = inlined_call_operand.vmem [shape: f32[1,32], index: 2, kind: input, shape index: {}]   ;;  %s2397_s3 = inlined_call_operand.hbm [shape: f32[32,32], index: 3, kind: input, shape index: {}]   ;;  %s2398_s4 = inlined_call_operand.vmem [shape: f32[1,32], index: 4, kind: input, shape index: {}]   ;;  %s2399_s5 = inlined_call_operand.hbm [shape: f32[32,32], index: 5, kind: input, shape index: {}]   ;;  %s2400_s6 = inlined_call_operand.vmem [shape: f32[1,32], index: 6, kind: input, shape index: {}]   ;;  %s2401_s7 = inlined_call_operand.hbm [shape: f32[2,4,8,8], index: 7, kind: output, shape index: {0}]   ;;  %s2402_s8 = inlined_call_operand.hbm [shape: f32[2,4,8,8], index: 8, kind: output, shape index: {1}]   ;;  %s2403_s9 = inlined_call_operand.hbm [shape: f32[2,4,8,8], index: 9, kind: output, shape index: {2}]  }
   0x1   :  { %2415 = sst [smem:[#allocation21_spill]] %s2401_s7 }
   0x2   :  { %2416 = sst [smem:[#allocation22_spill]] %s2402_s8 }
   0x3   :  { %2417 = sst [smem:[#allocation23_spill]] %s2403_s9 }
   0x4   :  { %15 = vsyncpa [#allocation3], 0 }
   0x5   :  { %17 = vsyncpa [#allocation3 + $0x1], 0 }
   0x6   :  { %18 = vsyncpa [#allocation6], 0 }
   0x7   :  { %19 = vsyncpa [#allocation9], 0 }
   0x8   :  { %20 = vsyncpa [#allocation4], 0 }
   0x9   :  { %22 = vsyncpa [#allocation4 + $0x1], 0 }
   0xa   :  { %23 = vsyncpa [#allocation12], 0 }
   0xb   :  { %25 = vsyncpa [#allocation12 + $0x1], 0  ;;  %s1926_s30 = smov 0   ;;  %s1928_s10 = smov 0  }
   0xc   :  { %s1930_s11 = smov 0   ;;  %s1932_s12 = smov 0  }
   0xd   :  { %s1934_s13 = smov 0   ;;  %s1936_s14 = smov 0  }
   0xe LB: > { %2418 = sst [smem:[#allocation19_spill]] %s1835_s30  ;;  %s1957_s15 = sadd.s32 4294967295, %s1855_s14   ;;  %s1855_s14 = sphi %s1936_s14, %s31_s14   ;;  %s1851_s13 = sphi %s1934_s13, %s2449_s13   ;;  %s1847_s12 = sphi %s1932_s12, %s2448_s12   ;;  %s1843_s11 = sphi %s1930_s11, %s2447_s11   ;;  %s1839_s10 = sphi %s1928_s10, %s2446_s10   ;;  %s1835_s30 = sphi %s1926_s30, %s2445_s30  }
   0xf   : > { %s2404_s16 = sadd.s32 4294967294, %s1855_s14   ;;  %p65_p0 = scmp.ne.s32.totalorder %s1839_s10, %s1835_s30 }
  0x10   : > { %p2406_p1 = scmp.eq.s32.totalorder %s1957_s15, 0  ;;  %p223_p3 = scmp.eq.s32.totalorder %s2404_s16, 1 }
  0x11   : > { %p1369_p5 = scmp.ge.s32.totalorder %s1855_s14, 1  ;;  %p286_p7 = scmp.lt.s32.totalorder %s1855_s14, 3 }
  0x12   : > { %p1968_p4 = por %p2406_p1, %p65_p0  ;;  %p1973_p6 = por %p223_p3, %p65_p0 }
  0x13   : > { %p1978_p8 = pnand %p1369_p5, %p286_p7  ;;  %s1857_s20 = smov [#allocation5]  }
  0x14   : > { %s2419_s17 = scalar_select %p1968_p4, 1, 0 }
  0x15   : > { %s2420_s18 = scalar_select %p1973_p6, 1, 0 }
  0x16   : > { %s2422_s19 = scalar_select %p1978_p8, 1, 0 }
  0x17   : > { %2421 = sst [smem:[#allocation20_spill]] %s2420_s18  ;;  %s298_s21 = sshll.u32 %s1857_s20, 4  ;;  %s1982_s21 = int_to_ptr.vmem [resolvable:$true] %s298_s21 }
  0x18   : > { %p1496_p9 = pneg %p1978_p8  ;;  %s1858_s23 = smov [#allocation7]  }
  0x19   : > { %s314_s24 = sshll.u32 %s1858_s23, 4  ;;  %s1859_s25 = smov [#allocation8]   ;;  %s1993_s24 = int_to_ptr.vmem [resolvable:$true] %s314_s24 }
  0x1a   : > { %p1989_p11 = pnand %p1496_p9, %p2406_p1  ;;  %s1995_s26 = sshll.u32 %s1859_s25, 4  ;;  %s331_s26 = int_to_ptr.vmem [resolvable:$true] %s1995_s26 }
  0x1b   : > { %s1591_s29 = scalar_lea.hbm %s2395_s1, 512 }
  0x1c   : > { %p1592_p12 = scmp.ne.s32.totalorder %s2395_s1, %s1591_s29  ;;  %p2005_p13 = pneg %p1989_p11 }
  0x1d   : > { %p1598_p5 = scmp.lt.u32.totalorder %s1591_s29, %s2395_s1 }
  0x1e   : > { %p1594_p0 = pnand %p2005_p13, %p1592_p12 }
  0x20   : > { %p1595_p3 = pneg %p1594_p0 }
  0x22   : > { %p1600_p7 = pnand %p1598_p5, %p1595_p3 }
  0x24   : > { %1603 = shalt.err (!%p1600_p7)
}
  0x25   : > { %s1604_s16 = scalar_lea.vmem %s1982_s21, 512  ;;  %p1612_p2 = scmp.lt.s32.totalorder %s1982_s21, %s1982_s21 }
  0x26   : > { %p1605_p9 = scmp.ne.s32.totalorder %s1982_s21, %s1604_s16  ;;  %p1613_p6 = scmp.lt.s32.totalorder %s1604_s16, %s1604_s16 }
  0x28   : > { %p1607_p10 = pnand %p1605_p9, %p2005_p13  ;;  %p1614_p12 = por %p1613_p6, %p1612_p2 }
  0x2a   : > { %p1608_p1 = pneg %p1607_p10 }
  0x2c   : > { %p1615_p0 = pnand %p1614_p12, %p1608_p1 }
  0x2e   : > { %1618 = shalt.err (!%p1615_p0)
}
  0x2f   : > { %s1860_s27 = smov 128   ;;  %s1861_s28 = smov 8  }
  0x30   : > { %1499 = dma.hbm_to_vmem [thread:$0]  (!%p1989_p11), %s2395_s1, 512, %s1982_s21, [#allocation6], %s1860_s27, %s1860_s27, %s1861_s28  }
  0x31   : > { %s1619_s16 = scalar_lea.hbm %s2397_s3, 512 }
  0x32   : > { %p1620_p1 = scmp.ne.s32.totalorder %s2397_s3, %s1619_s16  ;;  %p1626_p10 = scmp.lt.u32.totalorder %s1619_s16, %s2397_s3 }
  0x34   : > { %p1622_p2 = pnand %p1620_p1, %p2005_p13 }
  0x36   : > { %p1623_p6 = pneg %p1622_p2 }
  0x38   : > { %p1628_p3 = pnand %p1626_p10, %p1623_p6 }
  0x3a   : > { %1631 = shalt.err (!%p1628_p3)
}
  0x3b   : > { %s1632_s21 = scalar_lea.vmem %s1993_s24, 512  ;;  %p1640_p12 = scmp.lt.s32.totalorder %s1993_s24, %s1993_s24 }
  0x3c   : > { %p1633_p5 = scmp.ne.s32.totalorder %s1993_s24, %s1632_s21  ;;  %p1641_p0 = scmp.lt.s32.totalorder %s1632_s21, %s1632_s21 }
  0x3e   : > { %p1635_p7 = pnand %p1633_p5, %p2005_p13  ;;  %p1642_p1 = por %p1641_p0, %p1640_p12 }
  0x40   : > { %p1636_p9 = pneg %p1635_p7 }
  0x42   : > { %p1643_p2 = pnand %p1642_p1, %p1636_p9 }
  0x44   : > { %1646 = shalt.err (!%p1643_p2)
}
  0x45   : > { %1502 = dma.hbm_to_vmem [thread:$0]  (!%p1989_p11), %s2397_s3, 512, %s1993_s24, [#allocation6], %s1860_s27, %s1860_s27, %s1861_s28  }
  0x46   : > { %s1647_s29 = scalar_lea.hbm %s2399_s5, 512 }
  0x47   : > { %p1648_p6 = scmp.ne.s32.totalorder %s2399_s5, %s1647_s29  ;;  %p1654_p5 = scmp.lt.u32.totalorder %s1647_s29, %s2399_s5 }
  0x49   : > { %p1650_p10 = pnand %p1648_p6, %p2005_p13 }
  0x4b   : > { %p1651_p3 = pneg %p1650_p10 }
  0x4d   : > { %p1656_p7 = pnand %p1654_p5, %p1651_p3 }
  0x4f   : > { %1659 = shalt.err (!%p1656_p7)
}
  0x50   : > { %s1660_s21 = scalar_lea.vmem %s331_s26, 512  ;;  %p1668_p1 = scmp.lt.s32.totalorder %s331_s26, %s331_s26 }
  0x51   : > { %p1661_p9 = scmp.ne.s32.totalorder %s331_s26, %s1660_s21  ;;  %p1669_p2 = scmp.lt.s32.totalorder %s1660_s21, %s1660_s21 }
  0x53   : > { %p1663_p12 = pnand %p1661_p9, %p2005_p13  ;;  %p1670_p4 = por %p1669_p2, %p1668_p1 }
  0x55   : > { %p1664_p0 = pneg %p1663_p12 }
  0x57   : > { %p1671_p8 = pnand %p1670_p4, %p1664_p0 }
  0x59   : > { %1674 = shalt.err (!%p1671_p8)
}
  0x5a   : > { %1505 = dma.hbm_to_vmem [thread:$0]  (!%p1989_p11), %s2399_s5, 512, %s331_s26, [#allocation9], %s1860_s27, %s1860_s27, %s1861_s28  }
  0x5b   : > { %s52_s18 = sadd.s32 1, %s1843_s11  ;;  %s43_s22 = sadd.s32 1, %s1851_s13 }
  0x5c   : > { %p59_p4 = scmp.ne.s32.totalorder %s1843_s11, %s1839_s10  ;;  %p45_p8 = scmp.ge.s32.totalorder %s43_s22, 2 }
  0x5d   : > { %p60_p13 = scmp.eq.s32.totalorder %s1855_s14, 0  ;;  %p2425_p6 = scmp.eq.s32.totalorder %s1957_s15, 1 }
  0x5e   : > { %p1523_p3 = scmp.lt.s32.totalorder %s1855_s14, 2  ;;  %s2451_s22 = smov (%p45_p8, %s43_s22), 0 }
  0x5f   : > { %p2084_p10 = por %p2425_p6, %p59_p4  ;;  %p61_p5 = por %p60_p13, %p59_p4 }
  0x60   : > { %s347_s9 = sand.u32 1, %s1843_s11   ;;  %s47_s30 = ssub.s32 %s1851_s13, %s2451_s22 }
  0x61   : > { %p50_p7 = scmp.eq.s32.totalorder %s47_s30, 0  ;;  %s1374_s26 = sshll.u32 %s347_s9, 3 }
  0x62   : > { %s1375_s27 = sshll.u32 %s1851_s13, 7  ;;  %s351_s25 = scalar_lea.vmem [#allocation2], %s1374_s26 }
  0x63   : > { %s2096_s28 = scalar_select %p50_p7, %s1843_s11, %s52_s18  }
  0x64   : > { %s2101_s23 = scalar_lea.hbm %s2394_s0, %s1375_s27  ;;  %s359_s16 = sshll.u32 %s351_s25, 4  ;;  %s2103_s16 = int_to_ptr.vmem [resolvable:$true] %s359_s16 }
  0x65   : > { %p2107_p11 = pnand %p1523_p3, %p61_p5  ;;  %s348_s24 = scalar_lea.sflag [#allocation3], %s347_s9 }
  0x66   : > { %s1675_s7 = scalar_lea.hbm %s2101_s23, 128  ;;  %s1680_s26 = scalar_lea.hbm %s2394_s0, 256 }
  0x67   : > { %p1676_p9 = scmp.ne.s32.totalorder %s2101_s23, %s1675_s7  ;;  %p1677_p12 = pneg %p2107_p11 }
  0x68   : > { %p1681_p2 = scmp.lt.u32.totalorder %s2101_s23, %s2394_s0  ;;  %p1682_p4 = scmp.lt.u32.totalorder %s1680_s26, %s1675_s7 }
  0x69   : > { %p1678_p0 = pnand %p1677_p12, %p1676_p9  ;;  %p1684_p13 = scmp.lt.u32.totalorder %s1675_s7, %s2101_s23 }
  0x6a   : > { %p1683_p8 = por %p1682_p4, %p1681_p2 }
  0x6b   : > { %p1679_p1 = pneg %p1678_p0 }
  0x6c   : > { %p1685_p6 = por %p1684_p13, %p1683_p8 }
  0x6e   : > { %p1686_p3 = pnand %p1685_p6, %p1679_p1 }
  0x70   : > { %1689 = shalt.err (!%p1686_p3)
}
  0x71   : > { %s1690_s9 = scalar_lea.vmem %s2103_s16, 128  ;;  %s1862_s20 = smov [#allocation2]  }
  0x72   : > { %p1691_p5 = scmp.ne.s32.totalorder %s2103_s16, %s1690_s9  ;;  %s1695_s25 = sshll.u32 %s1862_s20, 4  ;;  %s1696_s25 = int_to_ptr.vmem [resolvable:$false] %s1695_s25 }
  0x73   : > { %s1697_s18 = scalar_lea.vmem %s1696_s25, 256  ;;  %p1698_p0 = scmp.lt.s32.totalorder %s2103_s16, %s1696_s25 }
  0x74   : > { %p1693_p7 = pnand %p1691_p5, %p1677_p12  ;;  %p1699_p2 = scmp.lt.s32.totalorder %s1697_s18, %s1690_s9 }
  0x76   : > { %p1694_p9 = pneg %p1693_p7  ;;  %p1700_p4 = por %p1699_p2, %p1698_p0 }
  0x78   : > { %p1701_p8 = pnand %p1700_p4, %p1694_p9 }
  0x7a   : > { %1704 = shalt.err (!%p1701_p8)
}
  0x7b   : > { %1509 = dma.hbm_to_vmem [thread:$0]  (!%p2107_p11), %s2101_s23, 128, %s2103_s16, %s348_s24  }
  0x7c   : > { %p2428_p1 = scmp.ne.s32.totalorder %s2422_s19, 0 }
  0x7d   : > { %s2139_s7 = sand.u32 (!%p2428_p1), 1, %s1839_s10   ;;  %p2429_p12 = scmp.ne.s32.totalorder (!%p2428_p1), %s2419_s17, 0 }
  0x7e   : > { %368 = sbr.rel (%p2428_p1) target bundleno = 577 (0x241), region = 48  ;;  %s1377_s30 = sshll.u32 (!%p2428_p1), %s2139_s7, 3 }
  0x7f   : > { %s371_s26 = scalar_lea.sflag (!%p2428_p1), [#allocation3], %s2139_s7  ;;  %s2143_s27 = scalar_lea.vmem (!%p2428_p1), [#allocation2], %s1377_s30 }
  0x85   : > { %1814 = dma.done.wait (%p2429_p12), %s371_s26, 128  }
  0x86   : > { %1816 = vsyncadd (%p2429_p12), %s371_s26, 4294967168  ;;  %p2430_p11 = scmp.eq.s32.totalorder %s1957_s15, 0 }
  0x88   : > { %1818 = dma.done.wait (%p2430_p11), [#allocation6], 1024   ;;  %p2431_p13 = pmov %p2430_p11 }
  0x89   : > { %p2432_p6 = pmov %p2430_p11 }
  0x8a   : > { %1820 = vsyncadd (%p2431_p13), [#allocation6], 4294966272 }
  0x8b   : > { %1822 = dma.done.wait (%p2432_p6), [#allocation9], 512   ;;  %p2433_p3 = pmov %p2432_p6 }
  0x8c   : > { %v1863_v0 = vmov 0.0|0.0   ;;  %vm1864_vm0 = vmmov 0   ;;  %v1865_v1 = vmov 0.0   ;;  %v668_v2 = vld [vmem:[#allocation7] sm:$0xff]  ;;  %v669_v3 = vld [vmem:[#allocation7 + $0x8] sm:$0xff]  ;;  %v670_v7 = vld [vmem:[#allocation7 + $0x10] sm:$0xff]  ;;  %v532_v35 = vlaneseq }
  0x8d   : > { %1824 = vsyncadd (%p2433_p3), [#allocation9], 4294966784  ;;  %1464 = vmatprep.subr.bf16.mxu1 %v1863_v0  ;;  %1458 = vmatprep.subr.bf16.mxu0 %v1863_v0  ;;  %v432_v4 = vld [vmem:[#allocation5] sm:$0xff]  ;;  %v1465_v5 = vpack.c.bf16 %v669_v3, %v668_v2  ;;  %v433_v6 = vld [vmem:[#allocation5 + $0x8] sm:$0xff]  ;;  %vm443_vm1 = vcmask 261120   ;;  %s1866_s21 = smov 104  }
  0x8e   : > { %1444 = vmatprep.mubr.msk.f32.mxu1 %vm1864_vm0, %v1865_v1  ;;  %1433 = vmatprep.mubr.msk.f32.mxu0 %vm1864_vm0, %v1865_v1  ;;  %v671_v8 = vld [vmem:[#allocation7 + $0x18] sm:$0xff]  ;;  %v1459_v9 = vpack.c.bf16 %v433_v6, %v432_v4  ;;  %v434_v10 = vld [vmem:[#allocation5 + $0x10] sm:$0xff]  ;;  %v899_v14 = vld [vmem:[#allocation8] sm:$0xff]  ;;  %s1867_s24 = smov 120   ;;  %s1868_s29 = smov 112   ;;  %v533_v39 = vshrl.u32 %v532_v35, 7 }
  0x8f   : > { %v435_v11 = vld [vmem:[#allocation5 + $0x18] sm:$0xff]  ;;  %1466 = vmatpush3.bf16.msra.mxu1 %v1465_v5  ;;  %v1468_v12 = vpack.c.bf16 %v671_v8, %v670_v7  ;;  %v900_v15 = vld [vmem:[#allocation8 + $0x8] sm:$0xff]  ;;  %v901_v18 = vld [vmem:[#allocation8 + $0x10] sm:$0xff]  ;;  %v1869_v33 = vmov 1983009808   ;;  %vm663_vm2 = vcmask 64512  }
  0x90   : > { %1460 = vmatpush3.bf16.msra.mxu0 %v1459_v9  ;;  %1467 = vmatprep.subr.bf16.mxu1 %v1863_v0  ;;  %v1462_v13 = vpack.c.bf16 %v435_v11, %v434_v10  ;;  %v431_v16 = vld [vmem:[%s2143_s27] sm:$0xff]  ;;  %v1471_v17 = vpack.c.bf16 %v900_v15, %v899_v14  ;;  %v530_v34 = vunpack.c.l.s4 %v1869_v33  ;;  %v1870_v36 = vmov 1934713408   ;;  %s2194_s25 = sshll.u32 %s2139_s7, 5  ;;  %s1135_s18 = sand.u32 1, %s1957_s15  }
  0x91   : > { %1461 = vmatprep.subr.bf16.mxu0 %v1863_v0  ;;  %v902_v19 = vld [vmem:[#allocation8 + $0x18] sm:$0xff]  ;;  %v1388_v21 = vld [vmem:[%s2398_s4] ss:$0 sm:$0xff]  ;;  %v562_v37 = vunpack.c.l.s4 %v1870_v36  ;;  %s2206_s30 = sshll.u32 %s1847_s12, 9  ;;  %s423_s26 = scalar_lea.vmem [#allocation11], %s2194_s25 }
  0x92   : > { %v1474_v20 = vpack.c.bf16 %v902_v19, %v901_v18  ;;  %v1384_v23 = vld [vmem:[%s2396_s2] ss:$0 sm:$0xff]  ;;  %v531_v38 = vunpack.c.0.s8 %v530_v34  ;;  %s1172_s27 = sshll.u32 %s423_s26, 4  ;;  %s2434_s19 = sld [smem:[#allocation22_spill]]  ;;  %s2223_s27 = int_to_ptr.vmem [resolvable:$true] %s1172_s27 }
  0x93   : > { %1469 = vmatpush3.bf16.msra.mxu1 %v1468_v12  ;;  %v1392_v29 = vld [vmem:[%s2400_s6] ss:$0 sm:$0xff]  ;;  %v563_v42 = vunpack.c.0.s8 %v562_v37  ;;  %s2234_s16 = scalar_lea.vmem [#allocation10], %s2194_s25  ;;  %s1871_s9 = smov [#allocation11]  }
  0x94   : > { %1463 = vmatpush3.bf16.msra.mxu0 %v1462_v13  ;;  %v2175_v43 = vsub.s32 %v531_v38, %v533_v39  ;;  %s1709_s20 = sshll.u32 %s1871_s9, 4  ;;  %s1710_s20 = int_to_ptr.vmem [resolvable:$false] %s1709_s20 }
  0x95   : > { %1470 = vmatprep.subr.bf16.mxu0 %v1863_v0  ;;  %v2177_v50 = vsub.s32 %v563_v42, %v533_v39  ;;  %p1712_p0 = scmp.lt.s32.totalorder %s2223_s27, %s1710_s20 }
  0x96   : > { %1445 = vmatmul.mubr.msk.f32.vlgmr.msra.gmra.mrb[0].mxu1 %vm443_vm1, %v431_v16 }
  0x97   : > { %1434 = vmatmul.mubr.msk.f32.vlgmr.msra.gmra.mrb[0].mxu0 %vm443_vm1, %v431_v16 }
  0x98   : > { %1472 = vmatpush3.bf16.msra.mxu0 %v1471_v17  ;;  %1455 = vmatprep.mubr.msk.f32.mxu0 %vm1864_vm0, %v1865_v1  ;;  %s2221_s23 = scalar_lea.hbm %s2434_s19, %s2206_s30 }
  0x99   : > { %1473 = vmatprep.subr.bf16.mxu0 %v1863_v0 }
  0x9c   : > { %1475 = vmatpush3.bf16.msra.mxu0 %v1474_v20 }
  0x9f   : > { %1456 = vmatmul.mubr.msk.f32.vlgmr.msra.gmra.mrb[2].mxu0 %vm443_vm1, %v431_v16 }
 0x169   : > { %v745_v22 = vpop.f32.mrb[0].mxu1 }
 0x16a   : > { %v746_v24 = vadd.f32 %v1388_v21, %v745_v22  ;;  %v1446_v25 = vpop.f32.mrb[1].mxu1  ;;  %v513_v26 = vpop.f32.mrb[0].mxu0 }
 0x16b   : > { %v1435_v27 = vpop.f32.mrb[1].mxu0  ;;  %v514_v28 = vadd.f32 %v1384_v23, %v513_v26 }
 0x16c   : > { %756 = vrot.lane.b32.xlu1 %v746_v24, %s1866_s21  ;;  %750 = vrot.lane.b32.xlu0 %v746_v24, %s1867_s24 }
 0x170   : > { %753 = vrot.lane.b32.xlu0 %v746_v24, %s1868_s29  ;;  %518 = vrot.lane.b32.xlu1 %v514_v28, %s1867_s24 }
 0x172   : > { %v976_v30 = vpop.f32.mrb[2].mxu0 }
 0x173   : > { %v1457_v31 = vpop.f32.mrb[3].mxu0  ;;  %v2170_v32 = vadd.f32 %v1392_v29, %v976_v30 }
 0x174   : > { %521 = vrot.lane.b32.xlu0 %v514_v28, %s1868_s29  ;;  %524 = vrot.lane.b32.xlu1 %v514_v28, %s1866_s21 }
 0x178   : > { %984 = vrot.lane.b32.xlu1 %v2170_v32, %s1868_s29  ;;  %981 = vrot.lane.b32.xlu0 %v2170_v32, %s1867_s24  ;;  %s2243_s24 = scalar_lea.sflag [#allocation12], %s1135_s18  ;;  %s1705_s29 = scalar_lea.vmem %s2223_s27, 512 }
 0x179   : > { %p1706_p5 = scmp.ne.s32.totalorder %s2223_s27, %s1705_s29 }
 0x17b   : > { %p1707_p7 = pnand %p1706_p5, %p2084_p10 }
 0x17c   : > { %987 = vrot.lane.b32.xlu0 %v2170_v32, %s1866_s21  ;;  %s1155_s21 = sshll.u32 %s2234_s16, 4  ;;  %s2282_s21 = int_to_ptr.vmem [resolvable:$true] %s1155_s21 }
 0x17d   : > { %p1708_p9 = pneg %p1707_p7 }
 0x1de   : > { %v757_v40 = vpop.permute.xlu1 %756  ;;  %v751_v41 = vpop.permute.xlu0 %750 }
 0x1df   : > { %v775_v44 = vcombine.low %v751_v41, %v757_v40  ;;  %v776_v45 = vcombine.high %v751_v41, %v757_v40 }
 0x1e1   : > { %v783_v51 = vrot.slane %v775_v44, %v2175_v43  ;;  %v790_v52 = vrot.slane %v776_v45, %v2175_v43 }
 0x1e2   : > { %v754_v46 = vpop.permute.xlu0 %753  ;;  %v519_v47 = vpop.permute.xlu1 %518 }
 0x1e3   : > { %v759_v48 = vcombine.low %v746_v24, %v754_v46  ;;  %v760_v49 = vcombine.high %v746_v24, %v754_v46 }
 0x1e5   : > { %v767_v53 = vrot.slane %v759_v48, %v2175_v43  ;;  %v774_v54 = vrot.slane %v760_v49, %v2175_v43 }
 0x1e6   : > { %v522_v55 = vpop.permute.xlu0 %521  ;;  %v525_v56 = vpop.permute.xlu1 %524 }
 0x1e7   : > { %v791_v57 = vcombine.low %v767_v53, %v783_v51  ;;  %v792_v58 = vcombine.high %v767_v53, %v783_v51  ;;  %v807_v59 = vcombine.low %v774_v54, %v790_v52  ;;  %v808_v60 = vcombine.high %v774_v54, %v790_v52 }
 0x1e8   : > { %v527_v61 = vcombine.low %v514_v28, %v522_v55  ;;  %v528_v62 = vcombine.high %v514_v28, %v522_v55  ;;  %v543_v63 = vcombine.low %v519_v47, %v525_v56  ;;  %v544_v0 = vcombine.high %v519_v47, %v525_v56 }
 0x1e9   : > { %v799_v1 = vrot.slane %v791_v57, %v2177_v50  ;;  %v806_v2 = vrot.slane %v792_v58, %v2177_v50  ;;  %v815_v3 = vrot.slane %v807_v59, %v2177_v50  ;;  %v822_v4 = vrot.slane %v808_v60, %v2177_v50 }
 0x1ea   : > { %v535_v5 = vrot.slane %v527_v61, %v2175_v43  ;;  %v542_v6 = vrot.slane %v528_v62, %v2175_v43  ;;  %v551_v7 = vrot.slane %v543_v63, %v2175_v43  ;;  %v558_v8 = vrot.slane %v544_v0, %v2175_v43  ;;  %v2191_v17 = vpop.permute.xlu0 %981  ;;  %v985_v44 = vpop.permute.xlu1 %984 }
 0x1eb   : > { %v827_v9 = vcombine.low %v799_v1, %v806_v2  ;;  %v1390_v10 = vcombine.high %v799_v1, %v806_v2  ;;  %v843_v11 = vcombine.low %v815_v3, %v822_v4  ;;  %v1391_v12 = vcombine.high %v815_v3, %v822_v4 }
 0x1ec   : > { %v559_v13 = vcombine.low %v535_v5, %v551_v7  ;;  %v560_v14 = vcombine.high %v535_v5, %v551_v7  ;;  %v575_v15 = vcombine.low %v542_v6, %v558_v8  ;;  %v576_v16 = vcombine.high %v542_v6, %v558_v8 }
 0x1ed   : > { %v834_v18 = vrot.slane %v827_v9, %v2175_v43  ;;  %v842_v19 = vrot.slane %v1390_v10, %v2175_v43  ;;  %v850_v20 = vrot.slane %v843_v11, %v2175_v43  ;;  %v858_v21 = vrot.slane %v1391_v12, %v2175_v43 }
 0x1ee   : > { %v567_v22 = vrot.slane %v559_v13, %v2177_v50  ;;  %v574_v23 = vrot.slane %v560_v14, %v2177_v50  ;;  %v583_v24 = vrot.slane %v575_v15, %v2177_v50  ;;  %v590_v25 = vrot.slane %v576_v16, %v2177_v50  ;;  %v988_v45 = vpop.permute.xlu0 %987 }
 0x1ef   : > { %v859_v26 = vcombine.low %v834_v18, %v842_v19  ;;  %v860_v27 = vcombine.high %v834_v18, %v842_v19  ;;  %v875_v28 = vcombine.low %v850_v20, %v858_v21  ;;  %v876_v29 = vcombine.high %v850_v20, %v858_v21 }
 0x1f0   : > { %v595_v30 = vcombine.low %v567_v22, %v574_v23  ;;  %v1386_v31 = vcombine.high %v567_v22, %v574_v23  ;;  %v611_v33 = vcombine.low %v583_v24, %v590_v25  ;;  %v1387_v34 = vcombine.high %v583_v24, %v590_v25 }
 0x1f1   : > { %v867_v35 = vrot.slane %v859_v26, %v2177_v50  ;;  %v874_v36 = vrot.slane %v860_v27, %v2177_v50  ;;  %v883_v37 = vrot.slane %v875_v28, %v2177_v50  ;;  %v890_v38 = vrot.slane %v876_v29, %v2177_v50 }
 0x1f2   : > { %v602_v39 = vrot.slane %v595_v30, %v2175_v43  ;;  %v610_v40 = vrot.slane %v1386_v31, %v2175_v43  ;;  %v618_v41 = vrot.slane %v611_v33, %v2175_v43  ;;  %v626_v42 = vrot.slane %v1387_v34, %v2175_v43 }
 0x1f3   : > { %v891_v46 = vcombine.low %v867_v35, %v883_v37  ;;  %v892_v47 = vcombine.high %v867_v35, %v883_v37  ;;  %v893_v48 = vcombine.low %v874_v36, %v890_v38  ;;  %v894_v49 = vcombine.high %v874_v36, %v890_v38 }
 0x1f4   : > { %v627_v51 = vcombine.low %v602_v39, %v610_v40  ;;  %v628_v52 = vcombine.high %v602_v39, %v610_v40  ;;  %v643_v53 = vcombine.low %v618_v41, %v626_v42  ;;  %v644_v54 = vcombine.high %v618_v41, %v626_v42 }
 0x1f5   : > { %v990_v55 = vcombine.low %v2170_v32, %v985_v44  ;;  %v991_v56 = vcombine.high %v2170_v32, %v985_v44  ;;  %v1006_v57 = vcombine.low %v2191_v17, %v988_v45  ;;  %v1007_v58 = vcombine.high %v2191_v17, %v988_v45  ;;  %895 = vst.msk [vmem:[%s423_s26] sm:$0xff] %vm663_vm2, %v891_v46 }
 0x1f6   : > { %896 = vst.msk [vmem:[%s423_s26 + $0x8] sm:$0xff] %vm663_vm2, %v892_v47  ;;  %897 = vst.msk [vmem:[%s423_s26 + $0x10] sm:$0xff] %vm663_vm2, %v893_v48  ;;  %v635_v32 = vrot.slane %v627_v51, %v2177_v50  ;;  %v642_v59 = vrot.slane %v628_v52, %v2177_v50  ;;  %v651_v60 = vrot.slane %v643_v53, %v2177_v50 }
 0x1f7   : > { %898 = vst.msk [vmem:[%s423_s26 + $0x18] sm:$0xff] %vm663_vm2, %v894_v49  ;;  %v658_v61 = vrot.slane %v644_v54, %v2177_v50  ;;  %s1711_s26 = scalar_lea.vmem %s1710_s20, 1024 }
 0x1f8   : > { %p1713_p2 = scmp.lt.s32.totalorder %s1711_s26, %s1705_s29 }
 0x1fa   : > { %p1714_p4 = por %p1713_p2, %p1712_p0 }
 0x1fc   : > { %p1715_p8 = pnand %p1714_p4, %p1708_p9 }
 0x1fe   : > { %1718 = shalt.err (!%p1715_p8)
}
 0x1ff   : > { %s1719_s15 = scalar_lea.hbm %s2221_s23, 512  ;;  %s1723_s17 = scalar_lea.hbm %s2434_s19, 1024 }
 0x200   : > { %p1720_p1 = scmp.ne.s32.totalorder %s2221_s23, %s1719_s15  ;;  %p1724_p13 = scmp.lt.u32.totalorder %s2221_s23, %s2434_s19 }
 0x201   : > { %p1725_p6 = scmp.lt.u32.totalorder %s1723_s17, %s1719_s15  ;;  %p1727_p5 = scmp.lt.u32.totalorder %s1719_s15, %s2221_s23 }
 0x202   : > { %p1721_p12 = pnand %p1720_p1, %p2084_p10 }
 0x203   : > { %p1726_p3 = por %p1725_p6, %p1724_p13 }
 0x204   : > { %p1722_p11 = pneg %p1721_p12 }
 0x205   : > { %p1728_p7 = por %p1727_p5, %p1726_p3 }
 0x207   : > { %p1729_p9 = pnand %p1728_p7, %p1722_p11 }
 0x209   : > { %1732 = shalt.err (!%p1729_p9)
}
 0x20a   : > { %s2413_s29 = smov 128   ;;  %s1873_s26 = smov 8   ;;  %v998_v62 = vrot.slane %v990_v55, %v2175_v43  ;;  %v1005_v63 = vrot.slane %v991_v56, %v2175_v43  ;;  %v1014_v0 = vrot.slane %v1006_v57, %v2175_v43  ;;  %v1021_v1 = vrot.slane %v1007_v58, %v2175_v43 }
 0x20b   : > { %1491 = dma.vmem_to_hbm [thread:$0]  (%p2084_p10), %s2223_s27, 512, %s2221_s23, %s2243_s24, %s2413_s29, %s2413_s29, %s1873_s26   ;;  %v659_v2 = vcombine.low %v635_v32, %v651_v60  ;;  %v660_v3 = vcombine.high %v635_v32, %v651_v60  ;;  %v661_v4 = vcombine.low %v642_v59, %v658_v61  ;;  %v662_v5 = vcombine.high %v642_v59, %v658_v61 }
 0x20c   : > { %s2435_s12 = sld [smem:[#allocation21_spill]]  ;;  %v1022_v6 = vcombine.low %v998_v62, %v1014_v0  ;;  %v1023_v7 = vcombine.high %v998_v62, %v1014_v0  ;;  %v1038_v8 = vcombine.low %v1005_v63, %v1021_v1  ;;  %v1039_v9 = vcombine.high %v1005_v63, %v1021_v1  ;;  %s1733_s9 = scalar_lea.vmem %s2282_s21, 512 }
 0x20d   : > { %664 = vst.msk [vmem:[%s2234_s16] sm:$0xff] %vm663_vm2, %v659_v2  ;;  %665 = vst.msk [vmem:[%s2234_s16 + $0x8] sm:$0xff] %vm663_vm2, %v660_v3  ;;  %p1734_p0 = scmp.ne.s32.totalorder %s2282_s21, %s1733_s9  ;;  %s1874_s20 = smov [#allocation10]  }
 0x20e   : > { %666 = vst.msk [vmem:[%s2234_s16 + $0x10] sm:$0xff] %vm663_vm2, %v661_v4  ;;  %667 = vst.msk [vmem:[%s2234_s16 + $0x18] sm:$0xff] %vm663_vm2, %v662_v5  ;;  %v1030_v10 = vrot.slane %v1022_v6, %v2177_v50  ;;  %v1037_v11 = vrot.slane %v1023_v7, %v2177_v50  ;;  %v1046_v12 = vrot.slane %v1038_v8, %v2177_v50  ;;  %s1737_s15 = sshll.u32 %s1874_s20, 4  ;;  %s1738_s15 = int_to_ptr.vmem [resolvable:$false] %s1737_s15 }
 0x20f   : > { %v1053_v13 = vrot.slane %v1039_v9, %v2177_v50  ;;  %p1735_p2 = pnand %p1734_p0, %p2084_p10  ;;  %s1739_s18 = scalar_lea.vmem %s1738_s15, 1024 }
 0x210   : > { %p1740_p8 = scmp.lt.s32.totalorder %s2282_s21, %s1738_s15  ;;  %p1741_p1 = scmp.lt.s32.totalorder %s1739_s18, %s1733_s9 }
 0x211   : > { %p1736_p4 = pneg %p1735_p2 }
 0x212   : > { %s2436_s17 = smov %s2435_s12  ;;  %s2278_s27 = scalar_lea.hbm %s2435_s12, %s2206_s30 }
 0x213   : > { %p1742_p12 = por %p1741_p1, %p1740_p8 }
 0x215   : > { %p1743_p11 = pnand %p1742_p12, %p1736_p4 }
 0x217   : > { %1746 = shalt.err (!%p1743_p11)
}
 0x218   : > { %s1747_s16 = scalar_lea.hbm %s2278_s27, 512  ;;  %s1751_s20 = scalar_lea.hbm %s2436_s17, 1024 }
 0x219   : > { %p1748_p13 = scmp.ne.s32.totalorder %s2278_s27, %s1747_s16  ;;  %p1752_p5 = scmp.lt.u32.totalorder %s2278_s27, %s2436_s17 }
 0x21a   : > { %p1753_p7 = scmp.lt.u32.totalorder %s1751_s20, %s1747_s16  ;;  %p1755_p0 = scmp.lt.u32.totalorder %s1747_s16, %s2278_s27 }
 0x21b   : > { %p1749_p6 = pnand %p1748_p13, %p2084_p10 }
 0x21c   : > { %p1754_p9 = por %p1753_p7, %p1752_p5 }
 0x21d   : > { %p1750_p3 = pneg %p1749_p6 }
 0x21e   : > { %p1756_p2 = por %p1755_p0, %p1754_p9 }
 0x220   : > { %p1757_p4 = pnand %p1756_p2, %p1750_p3 }
 0x222   : > { %1760 = shalt.err (!%p1757_p4)
}
 0x223   : > { %s2437_s9 = smov 128   ;;  %s2438_s18 = scalar_lea.sflag [#allocation4], %s2139_s7  ;;  %v1058_v14 = vcombine.low %v1030_v10, %v1037_v11  ;;  %v1394_v15 = vcombine.high %v1030_v10, %v1037_v11  ;;  %v1074_v16 = vcombine.low %v1046_v12, %v1053_v13  ;;  %v1395_v17 = vcombine.high %v1046_v12, %v1053_v13 }
 0x224   : > { %1490 = dma.vmem_to_hbm [thread:$0]  (%p2084_p10), %s2282_s21, 512, %s2278_s27, %s2438_s18, %s2437_s9, %s2437_s9, %s1873_s26  }
 0x225   : > { %v1065_v18 = vrot.slane %v1058_v14, %v2175_v43  ;;  %v1073_v19 = vrot.slane %v1394_v15, %v2175_v43  ;;  %v1081_v20 = vrot.slane %v1074_v16, %v2175_v43  ;;  %v1089_v21 = vrot.slane %v1395_v17, %v2175_v43  ;;  %s430_s7 = scalar_lea.vmem [#allocation13], %s2194_s25  ;;  %s2439_s23 = sld [smem:[#allocation23_spill]] }
 0x226   : > { %s1189_s29 = sshll.u32 %s430_s7, 4  ;;  %s2338_s29 = int_to_ptr.vmem [resolvable:$true] %s1189_s29 }
 0x227   : > { %v1090_v22 = vcombine.low %v1065_v18, %v1073_v19  ;;  %v1091_v23 = vcombine.high %v1065_v18, %v1073_v19  ;;  %v1106_v24 = vcombine.low %v1081_v20, %v1089_v21  ;;  %v1107_v25 = vcombine.high %v1081_v20, %v1089_v21  ;;  %s1761_s25 = scalar_lea.vmem %s2338_s29, 512 }
 0x228   : > { %p1762_p8 = scmp.ne.s32.totalorder %s2338_s29, %s1761_s25 }
 0x229   : > { %v1098_v26 = vrot.slane %v1090_v22, %v2177_v50  ;;  %v1105_v27 = vrot.slane %v1091_v23, %v2177_v50  ;;  %v1114_v28 = vrot.slane %v1106_v24, %v2177_v50  ;;  %v1121_v29 = vrot.slane %v1107_v25, %v2177_v50 }
 0x22a   : > { %p1763_p1 = pnand %p1762_p8, %p2084_p10 }
 0x22b   : > { %v1122_v30 = vcombine.low %v1098_v26, %v1114_v28  ;;  %v1123_v31 = vcombine.high %v1098_v26, %v1114_v28  ;;  %v1124_v33 = vcombine.low %v1105_v27, %v1121_v29  ;;  %v1125_v34 = vcombine.high %v1105_v27, %v1121_v29  ;;  %s2336_s16 = scalar_lea.hbm %s2439_s23, %s2206_s30  ;;  %s1875_s30 = smov [#allocation13]  }
 0x22c   : > { %p1764_p12 = pneg %p1763_p1  ;;  %s1765_s12 = sshll.u32 %s1875_s30, 4  ;;  %s1766_s12 = int_to_ptr.vmem [resolvable:$false] %s1765_s12 }
 0x22d   : > { %1126 = vst.msk [vmem:[%s430_s7] sm:$0xff] %vm663_vm2, %v1122_v30  ;;  %1127 = vst.msk [vmem:[%s430_s7 + $0x8] sm:$0xff] %vm663_vm2, %v1123_v31  ;;  %s1767_s20 = scalar_lea.vmem %s1766_s12, 1024  ;;  %p1768_p11 = scmp.lt.s32.totalorder %s2338_s29, %s1766_s12 }
 0x22e   : > { %1128 = vst.msk [vmem:[%s430_s7 + $0x10] sm:$0xff] %vm663_vm2, %v1124_v33  ;;  %1129 = vst.msk [vmem:[%s430_s7 + $0x18] sm:$0xff] %vm663_vm2, %v1125_v34  ;;  %p1769_p13 = scmp.lt.s32.totalorder %s1767_s20, %s1761_s25 }
 0x230   : > { %p1770_p6 = por %p1769_p13, %p1768_p11 }
 0x232   : > { %p1771_p3 = pnand %p1770_p6, %p1764_p12 }
 0x234   : > { %1774 = shalt.err (!%p1771_p3)
}
 0x235   : > { %s1775_s15 = scalar_lea.hbm %s2336_s16, 512  ;;  %s1779_s21 = scalar_lea.hbm %s2439_s23, 1024 }
 0x236   : > { %p1776_p5 = scmp.ne.s32.totalorder %s2336_s16, %s1775_s15  ;;  %p1780_p0 = scmp.lt.u32.totalorder %s2336_s16, %s2439_s23 }
 0x237   : > { %p1781_p2 = scmp.lt.u32.totalorder %s1779_s21, %s1775_s15  ;;  %p1783_p8 = scmp.lt.u32.totalorder %s1775_s15, %s2336_s16 }
 0x238   : > { %p1777_p7 = pnand %p1776_p5, %p2084_p10 }
 0x239   : > { %p1782_p4 = por %p1781_p2, %p1780_p0 }
 0x23a   : > { %p1778_p9 = pneg %p1777_p7 }
 0x23b   : > { %p1784_p1 = por %p1783_p8, %p1782_p4 }
 0x23d   : > { %p1785_p12 = pnand %p1784_p1, %p1778_p9 }
 0x23f   : > { %1788 = shalt.err (!%p1785_p12)
}
 0x240   : > { %1492 = dma.vmem_to_hbm [thread:$0]  (%p2084_p10), %s2338_s29, 512, %s2336_s16, %s2243_s24, %s2437_s9, %s2437_s9, %s1873_s26  }
 0x241 PF: > { %s2440_s25 = sld [smem:[#allocation19_spill]]  ;;  %s2441_s12 = sld [smem:[#allocation20_spill]] }
 0x242   : > { %p2443_p13 = scmp.ge.s32.totalorder %s1855_s14, 2 }
 0x247   : > { %s1204_s20 = sand.u32 1, %s2440_s25   ;;  %p2442_p11 = scmp.ne.s32.totalorder %s2441_s12, 0 }
 0x248   : > { %s1205_s15 = scalar_lea.sflag [#allocation4], %s1204_s20 }
 0x249   : > { %p1511_p6 = pnand %p2443_p13, %p2442_p11 }
 0x24b   : > { %1826 = dma.done.wait (!%p1511_p6), %s1205_s15, 512  }
 0x24c   : > { %1828 = vsyncadd (!%p1511_p6), %s1205_s15, 4294966784  ;;  %s2444_s8 = sadd.s32 4294967294, %s1855_s14  }
 0x24d   : > { %s1213_s18 = sand.u32 1, %s2444_s8  }
 0x24e   : > { %s1214_s7 = scalar_lea.sflag [#allocation12], %s1213_s18 }
 0x24f   : > { %1830 = dma.done.wait (!%p1511_p6), %s1214_s7, 1024  }
 0x250   : > { %1832 = vsyncadd (!%p1511_p6), %s1214_s7, 4294966272  ;;  %s31_s14 = sadd.s32 1, %s1855_s14   ;;  %s2445_s30 = smov %s1839_s10 }
 0x251   : > { %p28_p10 = scmp.ge.s32.totalorder %s31_s14, 4   ;;  %s2446_s10 = smov %s1843_s11 }
 0x252   : > { %s2447_s11 = smov %s2096_s28  ;;  %s2448_s12 = smov %s1851_s13 }
 0x253   : > { %s2449_s13 = smov %s2451_s22  ;;  %30 = sbr.rel (!%p28_p10) target bundleno = 14 (0xe), region = 137 }
 0x25a   :  { %1228 = vsyncpa [#allocation3], 1 }
 0x25b   :  { %1230 = vsyncpa [#allocation3 + $0x1], 1 }
 0x25c   :  { %1231 = vsyncpa [#allocation6], 1 }
 0x25d   :  { %1232 = vsyncpa [#allocation9], 1 }
 0x25e   :  { %1233 = vsyncpa [#allocation4], 1 }
 0x25f   :  { %1235 = vsyncpa [#allocation4 + $0x1], 1 }
 0x260   :  { %1236 = vsyncpa [#allocation12], 1 }
 0x261   :  { %1238 = vsyncpa [#allocation12 + $0x1], 1 }

// kernel: tpu_custom_call.1
= control target key start
LH: loop header
LB: loop body
LE: loop exit
PB: predicated region body
PF: predicated region fallthrough
CT: control target
= control target key end

     0   :  { %s2394_s0 = inlined_call_operand.hbm [shape: f32[2,8,32], index: 0, kind: input, shape index: {}]   ;;  %s2395_s1 = inlined_call_operand.hbm [shape: f32[32,32], index: 1, kind: input, shape index: {}]   ;;  %s2396_s2 = inlined_call_operand.vmem [shape: f32[1,32], index: 2, kind: input, shape index: {}]   ;;  %s2397_s3 = inlined_call_operand.hbm [shape: f32[32,32], index: 3, kind: input, shape index: {}]   ;;  %s2398_s4 = inlined_call_operand.vmem [shape: f32[1,32], index: 4, kind: input, shape index: {}]   ;;  %s2399_s5 = inlined_call_operand.hbm [shape: f32[32,32], index: 5, kind: input, shape index: {}]   ;;  %s2400_s6 = inlined_call_operand.vmem [shape: f32[1,32], index: 6, kind: input, shape index: {}]   ;;  %s2401_s7 = inlined_call_operand.hbm [shape: f32[2,4,8,8], index: 7, kind: output, shape index: {0}]   ;;  %s2402_s8 = inlined_call_operand.hbm [shape: f32[2,4,8,8], index: 8, kind: output, shape index: {1}]   ;;  %s2403_s9 = inlined_call_operand.hbm [shape: f32[2,4,8,8], index: 9, kind: output, shape index: {2}]  }
   0x1   :  { %2415 = sst [smem:[#allocation21_spill]] %s2401_s7 }
   0x2   :  { %2416 = sst [smem:[#allocation22_spill]] %s2402_s8 }
   0x3   :  { %2417 = sst [smem:[#allocation23_spill]] %s2403_s9 }
   0x4   :  { %15 = vsyncpa [#allocation3], 0 }
   0x5   :  { %17 = vsyncpa [#allocation3 + $0x1], 0 }
   0x6   :  { %18 = vsyncpa [#allocation6], 0 }
   0x7   :  { %19 = vsyncpa [#allocation9], 0 }
   0x8   :  { %20 = vsyncpa [#allocation4], 0 }
   0x9   :  { %22 = vsyncpa [#allocation4 + $0x1], 0 }
   0xa   :  { %23 = vsyncpa [#allocation12], 0 }
   0xb   :  { %25 = vsyncpa [#allocation12 + $0x1], 0  ;;  %s1926_s30 = smov 0   ;;  %s1928_s10 = smov 0  }
   0xc   :  { %s1930_s11 = smov 0   ;;  %s1932_s12 = smov 0  }
   0xd   :  { %s1934_s13 = smov 0   ;;  %s1936_s14 = smov 0  }
   0xe LB: > { %2418 = sst [smem:[#allocation19_spill]] %s1835_s30  ;;  %s1957_s15 = sadd.s32 4294967295, %s1855_s14   ;;  %s1855_s14 = sphi %s1936_s14, %s31_s14   ;;  %s1851_s13 = sphi %s1934_s13, %s2449_s13   ;;  %s1847_s12 = sphi %s1932_s12, %s2448_s12   ;;  %s1843_s11 = sphi %s1930_s11, %s2447_s11   ;;  %s1839_s10 = sphi %s1928_s10, %s2446_s10   ;;  %s1835_s30 = sphi %s1926_s30, %s2445_s30  }
   0xf   : > { %s2404_s16 = sadd.s32 4294967294, %s1855_s14   ;;  %p65_p0 = scmp.ne.s32.totalorder %s1839_s10, %s1835_s30 }
  0x10   : > { %p2406_p1 = scmp.eq.s32.totalorder %s1957_s15, 0  ;;  %p223_p3 = scmp.eq.s32.totalorder %s2404_s16, 1 }
  0x11   : > { %p1369_p5 = scmp.ge.s32.totalorder %s1855_s14, 1  ;;  %p286_p7 = scmp.lt.s32.totalorder %s1855_s14, 3 }
  0x12   : > { %p1968_p4 = por %p2406_p1, %p65_p0  ;;  %p1973_p6 = por %p223_p3, %p65_p0 }
  0x13   : > { %p1978_p8 = pnand %p1369_p5, %p286_p7  ;;  %s1857_s20 = smov [#allocation5]  }
  0x14   : > { %s2419_s17 = scalar_select %p1968_p4, 1, 0 }
  0x15   : > { %s2420_s18 = scalar_select %p1973_p6, 1, 0 }
  0x16   : > { %s2422_s19 = scalar_select %p1978_p8, 1, 0 }
  0x17   : > { %2421 = sst [smem:[#allocation20_spill]] %s2420_s18  ;;  %s298_s21 = sshll.u32 %s1857_s20, 4  ;;  %s1982_s21 = int_to_ptr.vmem [resolvable:$true] %s298_s21 }
  0x18   : > { %p1496_p9 = pneg %p1978_p8  ;;  %s1858_s23 = smov [#allocation7]  }
  0x19   : > { %s314_s24 = sshll.u32 %s1858_s23, 4  ;;  %s1859_s25 = smov [#allocation8]   ;;  %s1993_s24 = int_to_ptr.vmem [resolvable:$true] %s314_s24 }
  0x1a   : > { %p1989_p11 = pnand %p1496_p9, %p2406_p1  ;;  %s1995_s26 = sshll.u32 %s1859_s25, 4  ;;  %s331_s26 = int_to_ptr.vmem [resolvable:$true] %s1995_s26 }
  0x1b   : > { %s1591_s29 = scalar_lea.hbm %s2395_s1, 512 }
  0x1c   : > { %p1592_p12 = scmp.ne.s32.totalorder %s2395_s1, %s1591_s29  ;;  %p2005_p13 = pneg %p1989_p11 }
  0x1d   : > { %p1598_p5 = scmp.lt.u32.totalorder %s1591_s29, %s2395_s1 }
  0x1e   : > { %p1594_p0 = pnand %p2005_p13, %p1592_p12 }
  0x20   : > { %p1595_p3 = pneg %p1594_p0 }
  0x22   : > { %p1600_p7 = pnand %p1598_p5, %p1595_p3 }
  0x24   : > { %1603 = shalt.err (!%p1600_p7)
}
  0x25   : > { %s1604_s16 = scalar_lea.vmem %s1982_s21, 512  ;;  %p1612_p2 = scmp.lt.s32.totalorder %s1982_s21, %s1982_s21 }
  0x26   : > { %p1605_p9 = scmp.ne.s32.totalorder %s1982_s21, %s1604_s16  ;;  %p1613_p6 = scmp.lt.s32.totalorder %s1604_s16, %s1604_s16 }
  0x28   : > { %p1607_p10 = pnand %p1605_p9, %p2005_p13  ;;  %p1614_p12 = por %p1613_p6, %p1612_p2 }
  0x2a   : > { %p1608_p1 = pneg %p1607_p10 }
  0x2c   : > { %p1615_p0 = pnand %p1614_p12, %p1608_p1 }
  0x2e   : > { %1618 = shalt.err (!%p1615_p0)
}
  0x2f   : > { %s1860_s27 = smov 128   ;;  %s1861_s28 = smov 8  }
  0x30   : > { %1499 = dma.hbm_to_vmem [thread:$0]  (!%p1989_p11), %s2395_s1, 512, %s1982_s21, [#allocation6], %s1860_s27, %s1860_s27, %s1861_s28  }
  0x31   : > { %s1619_s16 = scalar_lea.hbm %s2397_s3, 512 }
  0x32   : > { %p1620_p1 = scmp.ne.s32.totalorder %s2397_s3, %s1619_s16  ;;  %p1626_p10 = scmp.lt.u32.totalorder %s1619_s16, %s2397_s3 }
  0x34   : > { %p1622_p2 = pnand %p1620_p1, %p2005_p13 }
  0x36   : > { %p1623_p6 = pneg %p1622_p2 }
  0x38   : > { %p1628_p3 = pnand %p1626_p10, %p1623_p6 }
  0x3a   : > { %1631 = shalt.err (!%p1628_p3)
}
  0x3b   : > { %s1632_s21 = scalar_lea.vmem %s1993_s24, 512  ;;  %p1640_p12 = scmp.lt.s32.totalorder %s1993_s24, %s1993_s24 }
  0x3c   : > { %p1633_p5 = scmp.ne.s32.totalorder %s1993_s24, %s1632_s21  ;;  %p1641_p0 = scmp.lt.s32.totalorder %s1632_s21, %s1632_s21 }
  0x3e   : > { %p1635_p7 = pnand %p1633_p5, %p2005_p13  ;;  %p1642_p1 = por %p1641_p0, %p1640_p12 }
  0x40   : > { %p1636_p9 = pneg %p1635_p7 }
  0x42   : > { %p1643_p2 = pnand %p1642_p1, %p1636_p9 }
  0x44   : > { %1646 = shalt.err (!%p1643_p2)
}
  0x45   : > { %1502 = dma.hbm_to_vmem [thread:$0]  (!%p1989_p11), %s2397_s3, 512, %s1993_s24, [#allocation6], %s1860_s27, %s1860_s27, %s1861_s28  }
  0x46   : > { %s1647_s29 = scalar_lea.hbm %s2399_s5, 512 }
  0x47   : > { %p1648_p6 = scmp.ne.s32.totalorder %s2399_s5, %s1647_s29  ;;  %p1654_p5 = scmp.lt.u32.totalorder %s1647_s29, %s2399_s5 }
  0x49   : > { %p1650_p10 = pnand %p1648_p6, %p2005_p13 }
  0x4b   : > { %p1651_p3 = pneg %p1650_p10 }
  0x4d   : > { %p1656_p7 = pnand %p1654_p5, %p1651_p3 }
  0x4f   : > { %1659 = shalt.err (!%p1656_p7)
}
  0x50   : > { %s1660_s21 = scalar_lea.vmem %s331_s26, 512  ;;  %p1668_p1 = scmp.lt.s32.totalorder %s331_s26, %s331_s26 }
  0x51   : > { %p1661_p9 = scmp.ne.s32.totalorder %s331_s26, %s1660_s21  ;;  %p1669_p2 = scmp.lt.s32.totalorder %s1660_s21, %s1660_s21 }
  0x53   : > { %p1663_p12 = pnand %p1661_p9, %p2005_p13  ;;  %p1670_p4 = por %p1669_p2, %p1668_p1 }
  0x55   : > { %p1664_p0 = pneg %p1663_p12 }
  0x57   : > { %p1671_p8 = pnand %p1670_p4, %p1664_p0 }
  0x59   : > { %1674 = shalt.err (!%p1671_p8)
}
  0x5a   : > { %1505 = dma.hbm_to_vmem [thread:$0]  (!%p1989_p11), %s2399_s5, 512, %s331_s26, [#allocation9], %s1860_s27, %s1860_s27, %s1861_s28  }
  0x5b   : > { %s52_s18 = sadd.s32 1, %s1843_s11  ;;  %s43_s22 = sadd.s32 1, %s1851_s13 }
  0x5c   : > { %p59_p4 = scmp.ne.s32.totalorder %s1843_s11, %s1839_s10  ;;  %p45_p8 = scmp.ge.s32.totalorder %s43_s22, 2 }
  0x5d   : > { %p60_p13 = scmp.eq.s32.totalorder %s1855_s14, 0  ;;  %p2425_p6 = scmp.eq.s32.totalorder %s1957_s15, 1 }
  0x5e   : > { %p1523_p3 = scmp.lt.s32.totalorder %s1855_s14, 2  ;;  %s2451_s22 = smov (%p45_p8, %s43_s22), 0 }
  0x5f   : > { %p2084_p10 = por %p2425_p6, %p59_p4  ;;  %p61_p5 = por %p60_p13, %p59_p4 }
  0x60   : > { %s347_s9 = sand.u32 1, %s1843_s11   ;;  %s47_s30 = ssub.s32 %s1851_s13, %s2451_s22 }
  0x61   : > { %p50_p7 = scmp.eq.s32.totalorder %s47_s30, 0  ;;  %s1374_s26 = sshll.u32 %s347_s9, 3 }
  0x62   : > { %s1375_s27 = sshll.u32 %s1851_s13, 7  ;;  %s351_s25 = scalar_lea.vmem [#allocation2], %s1374_s26 }
  0x63   : > { %s2096_s28 = scalar_select %p50_p7, %s1843_s11, %s52_s18  }
  0x64   : > { %s2101_s23 = scalar_lea.hbm %s2394_s0, %s1375_s27  ;;  %s359_s16 = sshll.u32 %s351_s25, 4  ;;  %s2103_s16 = int_to_ptr.vmem [resolvable:$true] %s359_s16 }
  0x65   : > { %p2107_p11 = pnand %p1523_p3, %p61_p5  ;;  %s348_s24 = scalar_lea.sflag [#allocation3], %s347_s9 }
  0x66   : > { %s1675_s7 = scalar_lea.hbm %s2101_s23, 128  ;;  %s1680_s26 = scalar_lea.hbm %s2394_s0, 256 }
  0x67   : > { %p1676_p9 = scmp.ne.s32.totalorder %s2101_s23, %s1675_s7  ;;  %p1677_p12 = pneg %p2107_p11 }
  0x68   : > { %p1681_p2 = scmp.lt.u32.totalorder %s2101_s23, %s2394_s0  ;;  %p1682_p4 = scmp.lt.u32.totalorder %s1680_s26, %s1675_s7 }
  0x69   : > { %p1678_p0 = pnand %p1677_p12, %p1676_p9  ;;  %p1684_p13 = scmp.lt.u32.totalorder %s1675_s7, %s2101_s23 }
  0x6a   : > { %p1683_p8 = por %p1682_p4, %p1681_p2 }
  0x6b   : > { %p1679_p1 = pneg %p1678_p0 }
  0x6c   : > { %p1685_p6 = por %p1684_p13, %p1683_p8 }
  0x6e   : > { %p1686_p3 = pnand %p1685_p6, %p1679_p1 }
  0x70   : > { %1689 = shalt.err (!%p1686_p3)
}
  0x71   : > { %s1690_s9 = scalar_lea.vmem %s2103_s16, 128  ;;  %s1862_s20 = smov [#allocation2]  }
  0x72   : > { %p1691_p5 = scmp.ne.s32.totalorder %s2103_s16, %s1690_s9  ;;  %s1695_s25 = sshll.u32 %s1862_s20, 4  ;;  %s1696_s25 = int_to_ptr.vmem [resolvable:$false] %s1695_s25 }
  0x73   : > { %s1697_s18 = scalar_lea.vmem %s1696_s25, 256  ;;  %p1698_p0 = scmp.lt.s32.totalorder %s2103_s16, %s1696_s25 }
  0x74   : > { %p1693_p7 = pnand %p1691_p5, %p1677_p12  ;;  %p1699_p2 = scmp.lt.s32.totalorder %s1697_s18, %s1690_s9 }
  0x76   : > { %p1694_p9 = pneg %p1693_p7  ;;  %p1700_p4 = por %p1699_p2, %p1698_p0 }
  0x78   : > { %p1701_p8 = pnand %p1700_p4, %p1694_p9 }
  0x7a   : > { %1704 = shalt.err (!%p1701_p8)
}
  0x7b   : > { %1509 = dma.hbm_to_vmem [thread:$0]  (!%p2107_p11), %s2101_s23, 128, %s2103_s16, %s348_s24  }
  0x7c   : > { %p2428_p1 = scmp.ne.s32.totalorder %s2422_s19, 0 }
  0x7d   : > { %s2139_s7 = sand.u32 (!%p2428_p1), 1, %s1839_s10   ;;  %p2429_p12 = scmp.ne.s32.totalorder (!%p2428_p1), %s2419_s17, 0 }
  0x7e   : > { %368 = sbr.rel (%p2428_p1) target bundleno = 577 (0x241), region = 48  ;;  %s1377_s30 = sshll.u32 (!%p2428_p1), %s2139_s7, 3 }
  0x7f   : > { %s371_s26 = scalar_lea.sflag (!%p2428_p1), [#allocation3], %s2139_s7  ;;  %s2143_s27 = scalar_lea.vmem (!%p2428_p1), [#allocation2], %s1377_s30 }
  0x85   : > { %1814 = dma.done.wait (%p2429_p12), %s371_s26, 128  }
  0x86   : > { %1816 = vsyncadd (%p2429_p12), %s371_s26, 4294967168  ;;  %p2430_p11 = scmp.eq.s32.totalorder %s1957_s15, 0 }
  0x88   : > { %1818 = dma.done.wait (%p2430_p11), [#allocation6], 1024   ;;  %p2431_p13 = pmov %p2430_p11 }
  0x89   : > { %p2432_p6 = pmov %p2430_p11 }
  0x8a   : > { %1820 = vsyncadd (%p2431_p13), [#allocation6], 4294966272 }
  0x8b   : > { %1822 = dma.done.wait (%p2432_p6), [#allocation9], 512   ;;  %p2433_p3 = pmov %p2432_p6 }
  0x8c   : > { %v1863_v0 = vmov 0.0|0.0   ;;  %vm1864_vm0 = vmmov 0   ;;  %v1865_v1 = vmov 0.0   ;;  %v668_v2 = vld [vmem:[#allocation7] sm:$0xff]  ;;  %v669_v3 = vld [vmem:[#allocation7 + $0x8] sm:$0xff]  ;;  %v670_v7 = vld [vmem:[#allocation7 + $0x10] sm:$0xff]  ;;  %v532_v35 = vlaneseq }
  0x8d   : > { %1824 = vsyncadd (%p2433_p3), [#allocation9], 4294966784  ;;  %1464 = vmatprep.subr.bf16.mxu1 %v1863_v0  ;;  %1458 = vmatprep.subr.bf16.mxu0 %v1863_v0  ;;  %v432_v4 = vld [vmem:[#allocation5] sm:$0xff]  ;;  %v1465_v5 = vpack.c.bf16 %v669_v3, %v668_v2  ;;  %v433_v6 = vld [vmem:[#allocation5 + $0x8] sm:$0xff]  ;;  %vm443_vm1 = vcmask 261120   ;;  %s1866_s21 = smov 104  }
  0x8e   : > { %1444 = vmatprep.mubr.msk.f32.mxu1 %vm1864_vm0, %v1865_v1  ;;  %1433 = vmatprep.mubr.msk.f32.mxu0 %vm1864_vm0, %v1865_v1  ;;  %v671_v8 = vld [vmem:[#allocation7 + $0x18] sm:$0xff]  ;;  %v1459_v9 = vpack.c.bf16 %v433_v6, %v432_v4  ;;  %v434_v10 = vld [vmem:[#allocation5 + $0x10] sm:$0xff]  ;;  %v899_v14 = vld [vmem:[#allocation8] sm:$0xff]  ;;  %s1867_s24 = smov 120   ;;  %s1868_s29 = smov 112   ;;  %v533_v39 = vshrl.u32 %v532_v35, 7 }
  0x8f   : > { %v435_v11 = vld [vmem:[#allocation5 + $0x18] sm:$0xff]  ;;  %1466 = vmatpush3.bf16.msra.mxu1 %v1465_v5  ;;  %v1468_v12 = vpack.c.bf16 %v671_v8, %v670_v7  ;;  %v900_v15 = vld [vmem:[#allocation8 + $0x8] sm:$0xff]  ;;  %v901_v18 = vld [vmem:[#allocation8 + $0x10] sm:$0xff]  ;;  %v1869_v33 = vmov 1983009808   ;;  %vm663_vm2 = vcmask 64512  }
  0x90   : > { %1460 = vmatpush3.bf16.msra.mxu0 %v1459_v9  ;;  %1467 = vmatprep.subr.bf16.mxu1 %v1863_v0  ;;  %v1462_v13 = vpack.c.bf16 %v435_v11, %v434_v10  ;;  %v431_v16 = vld [vmem:[%s2143_s27] sm:$0xff]  ;;  %v1471_v17 = vpack.c.bf16 %v900_v15, %v899_v14  ;;  %v530_v34 = vunpack.c.l.s4 %v1869_v33  ;;  %v1870_v36 = vmov 1934713408   ;;  %s2194_s25 = sshll.u32 %s2139_s7, 5  ;;  %s1135_s18 = sand.u32 1, %s1957_s15  }
  0x91   : > { %1461 = vmatprep.subr.bf16.mxu0 %v1863_v0  ;;  %v902_v19 = vld [vmem:[#allocation8 + $0x18] sm:$0xff]  ;;  %v1388_v21 = vld [vmem:[%s2398_s4] ss:$0 sm:$0xff]  ;;  %v562_v37 = vunpack.c.l.s4 %v1870_v36  ;;  %s2206_s30 = sshll.u32 %s1847_s12, 9  ;;  %s423_s26 = scalar_lea.vmem [#allocation11], %s2194_s25 }
  0x92   : > { %v1474_v20 = vpack.c.bf16 %v902_v19, %v901_v18  ;;  %v1384_v23 = vld [vmem:[%s2396_s2] ss:$0 sm:$0xff]  ;;  %v531_v38 = vunpack.c.0.s8 %v530_v34  ;;  %s1172_s27 = sshll.u32 %s423_s26, 4  ;;  %s2434_s19 = sld [smem:[#allocation22_spill]]  ;;  %s2223_s27 = int_to_ptr.vmem [resolvable:$true] %s1172_s27 }
  0x93   : > { %1469 = vmatpush3.bf16.msra.mxu1 %v1468_v12  ;;  %v1392_v29 = vld [vmem:[%s2400_s6] ss:$0 sm:$0xff]  ;;  %v563_v42 = vunpack.c.0.s8 %v562_v37  ;;  %s2234_s16 = scalar_lea.vmem [#allocation10], %s2194_s25  ;;  %s1871_s9 = smov [#allocation11]  }
  0x94   : > { %1463 = vmatpush3.bf16.msra.mxu0 %v1462_v13  ;;  %v2175_v43 = vsub.s32 %v531_v38, %v533_v39  ;;  %s1709_s20 = sshll.u32 %s1871_s9, 4  ;;  %s1710_s20 = int_to_ptr.vmem [resolvable:$false] %s1709_s20 }
  0x95   : > { %1470 = vmatprep.subr.bf16.mxu0 %v1863_v0  ;;  %v2177_v50 = vsub.s32 %v563_v42, %v533_v39  ;;  %p1712_p0 = scmp.lt.s32.totalorder %s2223_s27, %s1710_s20 }
  0x96   : > { %1445 = vmatmul.mubr.msk.f32.vlgmr.msra.gmra.mrb[0].mxu1 %vm443_vm1, %v431_v16 }
  0x97   : > { %1434 = vmatmul.mubr.msk.f32.vlgmr.msra.gmra.mrb[0].mxu0 %vm443_vm1, %v431_v16 }
  0x98   : > { %1472 = vmatpush3.bf16.msra.mxu0 %v1471_v17  ;;  %1455 = vmatprep.mubr.msk.f32.mxu0 %vm1864_vm0, %v1865_v1  ;;  %s2221_s23 = scalar_lea.hbm %s2434_s19, %s2206_s30 }
  0x99   : > { %1473 = vmatprep.subr.bf16.mxu0 %v1863_v0 }
  0x9c   : > { %1475 = vmatpush3.bf16.msra.mxu0 %v1474_v20 }
  0x9f   : > { %1456 = vmatmul.mubr.msk.f32.vlgmr.msra.gmra.mrb[2].mxu0 %vm443_vm1, %v431_v16 }
 0x169   : > { %v745_v22 = vpop.f32.mrb[0].mxu1 }
 0x16a   : > { %v746_v24 = vadd.f32 %v1388_v21, %v745_v22  ;;  %v1446_v25 = vpop.f32.mrb[1].mxu1  ;;  %v513_v26 = vpop.f32.mrb[0].mxu0 }
 0x16b   : > { %v1435_v27 = vpop.f32.mrb[1].mxu0  ;;  %v514_v28 = vadd.f32 %v1384_v23, %v513_v26 }
 0x16c   : > { %756 = vrot.lane.b32.xlu1 %v746_v24, %s1866_s21  ;;  %750 = vrot.lane.b32.xlu0 %v746_v24, %s1867_s24 }
 0x170   : > { %753 = vrot.lane.b32.xlu0 %v746_v24, %s1868_s29  ;;  %518 = vrot.lane.b32.xlu1 %v514_v28, %s1867_s24 }
 0x172   : > { %v976_v30 = vpop.f32.mrb[2].mxu0 }
 0x173   : > { %v1457_v31 = vpop.f32.mrb[3].mxu0  ;;  %v2170_v32 = vadd.f32 %v1392_v29, %v976_v30 }
 0x174   : > { %521 = vrot.lane.b32.xlu0 %v514_v28, %s1868_s29  ;;  %524 = vrot.lane.b32.xlu1 %v514_v28, %s1866_s21 }
 0x178   : > { %984 = vrot.lane.b32.xlu1 %v2170_v32, %s1868_s29  ;;  %981 = vrot.lane.b32.xlu0 %v2170_v32, %s1867_s24  ;;  %s2243_s24 = scalar_lea.sflag [#allocation12], %s1135_s18  ;;  %s1705_s29 = scalar_lea.vmem %s2223_s27, 512 }
 0x179   : > { %p1706_p5 = scmp.ne.s32.totalorder %s2223_s27, %s1705_s29 }
 0x17b   : > { %p1707_p7 = pnand %p1706_p5, %p2084_p10 }
 0x17c   : > { %987 = vrot.lane.b32.xlu0 %v2170_v32, %s1866_s21  ;;  %s1155_s21 = sshll.u32 %s2234_s16, 4  ;;  %s2282_s21 = int_to_ptr.vmem [resolvable:$true] %s1155_s21 }
 0x17d   : > { %p1708_p9 = pneg %p1707_p7 }
 0x1de   : > { %v757_v40 = vpop.permute.xlu1 %756  ;;  %v751_v41 = vpop.permute.xlu0 %750 }
 0x1df   : > { %v775_v44 = vcombine.low %v751_v41, %v757_v40  ;;  %v776_v45 = vcombine.high %v751_v41, %v757_v40 }
 0x1e1   : > { %v783_v51 = vrot.slane %v775_v44, %v2175_v43  ;;  %v790_v52 = vrot.slane %v776_v45, %v2175_v43 }
 0x1e2   : > { %v754_v46 = vpop.permute.xlu0 %753  ;;  %v519_v47 = vpop.permute.xlu1 %518 }
 0x1e3   : > { %v759_v48 = vcombine.low %v746_v24, %v754_v46  ;;  %v760_v49 = vcombine.high %v746_v24, %v754_v46 }
 0x1e5   : > { %v767_v53 = vrot.slane %v759_v48, %v2175_v43  ;;  %v774_v54 = vrot.slane %v760_v49, %v2175_v43 }
 0x1e6   : > { %v522_v55 = vpop.permute.xlu0 %521  ;;  %v525_v56 = vpop.permute.xlu1 %524 }
 0x1e7   : > { %v791_v57 = vcombine.low %v767_v53, %v783_v51  ;;  %v792_v58 = vcombine.high %v767_v53, %v783_v51  ;;  %v807_v59 = vcombine.low %v774_v54, %v790_v52  ;;  %v808_v60 = vcombine.high %v774_v54, %v790_v52 }
 0x1e8   : > { %v527_v61 = vcombine.low %v514_v28, %v522_v55  ;;  %v528_v62 = vcombine.high %v514_v28, %v522_v55  ;;  %v543_v63 = vcombine.low %v519_v47, %v525_v56  ;;  %v544_v0 = vcombine.high %v519_v47, %v525_v56 }
 0x1e9   : > { %v799_v1 = vrot.slane %v791_v57, %v2177_v50  ;;  %v806_v2 = vrot.slane %v792_v58, %v2177_v50  ;;  %v815_v3 = vrot.slane %v807_v59, %v2177_v50  ;;  %v822_v4 = vrot.slane %v808_v60, %v2177_v50 }
 0x1ea   : > { %v535_v5 = vrot.slane %v527_v61, %v2175_v43  ;;  %v542_v6 = vrot.slane %v528_v62, %v2175_v43  ;;  %v551_v7 = vrot.slane %v543_v63, %v2175_v43  ;;  %v558_v8 = vrot.slane %v544_v0, %v2175_v43  ;;  %v2191_v17 = vpop.permute.xlu0 %981  ;;  %v985_v44 = vpop.permute.xlu1 %984 }
 0x1eb   : > { %v827_v9 = vcombine.low %v799_v1, %v806_v2  ;;  %v1390_v10 = vcombine.high %v799_v1, %v806_v2  ;;  %v843_v11 = vcombine.low %v815_v3, %v822_v4  ;;  %v1391_v12 = vcombine.high %v815_v3, %v822_v4 }
 0x1ec   : > { %v559_v13 = vcombine.low %v535_v5, %v551_v7  ;;  %v560_v14 = vcombine.high %v535_v5, %v551_v7  ;;  %v575_v15 = vcombine.low %v542_v6, %v558_v8  ;;  %v576_v16 = vcombine.high %v542_v6, %v558_v8 }
 0x1ed   : > { %v834_v18 = vrot.slane %v827_v9, %v2175_v43  ;;  %v842_v19 = vrot.slane %v1390_v10, %v2175_v43  ;;  %v850_v20 = vrot.slane %v843_v11, %v2175_v43  ;;  %v858_v21 = vrot.slane %v1391_v12, %v2175_v43 }
 0x1ee   : > { %v567_v22 = vrot.slane %v559_v13, %v2177_v50  ;;  %v574_v23 = vrot.slane %v560_v14, %v2177_v50  ;;  %v583_v24 = vrot.slane %v575_v15, %v2177_v50  ;;  %v590_v25 = vrot.slane %v576_v16, %v2177_v50  ;;  %v988_v45 = vpop.permute.xlu0 %987 }
 0x1ef   : > { %v859_v26 = vcombine.low %v834_v18, %v842_v19  ;;  %v860_v27 = vcombine.high %v834_v18, %v842_v19  ;;  %v875_v28 = vcombine.low %v850_v20, %v858_v21  ;;  %v876_v29 = vcombine.high %v850_v20, %v858_v21 }
 0x1f0   : > { %v595_v30 = vcombine.low %v567_v22, %v574_v23  ;;  %v1386_v31 = vcombine.high %v567_v22, %v574_v23  ;;  %v611_v33 = vcombine.low %v583_v24, %v590_v25  ;;  %v1387_v34 = vcombine.high %v583_v24, %v590_v25 }
 0x1f1   : > { %v867_v35 = vrot.slane %v859_v26, %v2177_v50  ;;  %v874_v36 = vrot.slane %v860_v27, %v2177_v50  ;;  %v883_v37 = vrot.slane %v875_v28, %v2177_v50  ;;  %v890_v38 = vrot.slane %v876_v29, %v2177_v50 }
 0x1f2   : > { %v602_v39 = vrot.slane %v595_v30, %v2175_v43  ;;  %v610_v40 = vrot.slane %v1386_v31, %v2175_v43  ;;  %v618_v41 = vrot.slane %v611_v33, %v2175_v43  ;;  %v626_v42 = vrot.slane %v1387_v34, %v2175_v43 }
 0x1f3   : > { %v891_v46 = vcombine.low %v867_v35, %v883_v37  ;;  %v892_v47 = vcombine.high %v867_v35, %v883_v37  ;;  %v893_v48 = vcombine.low %v874_v36, %v890_v38  ;;  %v894_v49 = vcombine.high %v874_v36, %v890_v38 }
 0x1f4   : > { %v627_v51 = vcombine.low %v602_v39, %v610_v40  ;;  %v628_v52 = vcombine.high %v602_v39, %v610_v40  ;;  %v643_v53 = vcombine.low %v618_v41, %v626_v42  ;;  %v644_v54 = vcombine.high %v618_v41, %v626_v42 }
 0x1f5   : > { %v990_v55 = vcombine.low %v2170_v32, %v985_v44  ;;  %v991_v56 = vcombine.high %v2170_v32, %v985_v44  ;;  %v1006_v57 = vcombine.low %v2191_v17, %v988_v45  ;;  %v1007_v58 = vcombine.high %v2191_v17, %v988_v45  ;;  %895 = vst.msk [vmem:[%s423_s26] sm:$0xff] %vm663_vm2, %v891_v46 }
 0x1f6   : > { %896 = vst.msk [vmem:[%s423_s26 + $0x8] sm:$0xff] %vm663_vm2, %v892_v47  ;;  %897 = vst.msk [vmem:[%s423_s26 + $0x10] sm:$0xff] %vm663_vm2, %v893_v48  ;;  %v635_v32 = vrot.slane %v627_v51, %v2177_v50  ;;  %v642_v59 = vrot.slane %v628_v52, %v2177_v50  ;;  %v651_v60 = vrot.slane %v643_v53, %v2177_v50 }
 0x1f7   : > { %898 = vst.msk [vmem:[%s423_s26 + $0x18] sm:$0xff] %vm663_vm2, %v894_v49  ;;  %v658_v61 = vrot.slane %v644_v54, %v2177_v50  ;;  %s1711_s26 = scalar_lea.vmem %s1710_s20, 1024 }
 0x1f8   : > { %p1713_p2 = scmp.lt.s32.totalorder %s1711_s26, %s1705_s29 }
 0x1fa   : > { %p1714_p4 = por %p1713_p2, %p1712_p0 }
 0x1fc   : > { %p1715_p8 = pnand %p1714_p4, %p1708_p9 }
 0x1fe   : > { %1718 = shalt.err (!%p1715_p8)
}
 0x1ff   : > { %s1719_s15 = scalar_lea.hbm %s2221_s23, 512  ;;  %s1723_s17 = scalar_lea.hbm %s2434_s19, 1024 }
 0x200   : > { %p1720_p1 = scmp.ne.s32.totalorder %s2221_s23, %s1719_s15  ;;  %p1724_p13 = scmp.lt.u32.totalorder %s2221_s23, %s2434_s19 }
 0x201   : > { %p1725_p6 = scmp.lt.u32.totalorder %s1723_s17, %s1719_s15  ;;  %p1727_p5 = scmp.lt.u32.totalorder %s1719_s15, %s2221_s23 }
 0x202   : > { %p1721_p12 = pnand %p1720_p1, %p2084_p10 }
 0x203   : > { %p1726_p3 = por %p1725_p6, %p1724_p13 }
 0x204   : > { %p1722_p11 = pneg %p1721_p12 }
 0x205   : > { %p1728_p7 = por %p1727_p5, %p1726_p3 }
 0x207   : > { %p1729_p9 = pnand %p1728_p7, %p1722_p11 }
 0x209   : > { %1732 = shalt.err (!%p1729_p9)
}
 0x20a   : > { %s2413_s29 = smov 128   ;;  %s1873_s26 = smov 8   ;;  %v998_v62 = vrot.slane %v990_v55, %v2175_v43  ;;  %v1005_v63 = vrot.slane %v991_v56, %v2175_v43  ;;  %v1014_v0 = vrot.slane %v1006_v57, %v2175_v43  ;;  %v1021_v1 = vrot.slane %v1007_v58, %v2175_v43 }
 0x20b   : > { %1491 = dma.vmem_to_hbm [thread:$0]  (%p2084_p10), %s2223_s27, 512, %s2221_s23, %s2243_s24, %s2413_s29, %s2413_s29, %s1873_s26   ;;  %v659_v2 = vcombine.low %v635_v32, %v651_v60  ;;  %v660_v3 = vcombine.high %v635_v32, %v651_v60  ;;  %v661_v4 = vcombine.low %v642_v59, %v658_v61  ;;  %v662_v5 = vcombine.high %v642_v59, %v658_v61 }
 0x20c   : > { %s2435_s12 = sld [smem:[#allocation21_spill]]  ;;  %v1022_v6 = vcombine.low %v998_v62, %v1014_v0  ;;  %v1023_v7 = vcombine.high %v998_v62, %v1014_v0  ;;  %v1038_v8 = vcombine.low %v1005_v63, %v1021_v1  ;;  %v1039_v9 = vcombine.high %v1005_v63, %v1021_v1  ;;  %s1733_s9 = scalar_lea.vmem %s2282_s21, 512 }
 0x20d   : > { %664 = vst.msk [vmem:[%s2234_s16] sm:$0xff] %vm663_vm2, %v659_v2  ;;  %665 = vst.msk [vmem:[%s2234_s16 + $0x8] sm:$0xff] %vm663_vm2, %v660_v3  ;;  %p1734_p0 = scmp.ne.s32.totalorder %s2282_s21, %s1733_s9  ;;  %s1874_s20 = smov [#allocation10]  }
 0x20e   : > { %666 = vst.msk [vmem:[%s2234_s16 + $0x10] sm:$0xff] %vm663_vm2, %v661_v4  ;;  %667 = vst.msk [vmem:[%s2234_s16 + $0x18] sm:$0xff] %vm663_vm2, %v662_v5  ;;  %v1030_v10 = vrot.slane %v1022_v6, %v2177_v50  ;;  %v1037_v11 = vrot.slane %v1023_v7, %v2177_v50  ;;  %v1046_v12 = vrot.slane %v1038_v8, %v2177_v50  ;;  %s1737_s15 = sshll.u32 %s1874_s20, 4  ;;  %s1738_s15 = int_to_ptr.vmem [resolvable:$false] %s1737_s15 }
 0x20f   : > { %v1053_v13 = vrot.slane %v1039_v9, %v2177_v50  ;;  %p1735_p2 = pnand %p1734_p0, %p2084_p10  ;;  %s1739_s18 = scalar_lea.vmem %s1738_s15, 1024 }
 0x210   : > { %p1740_p8 = scmp.lt.s32.totalorder %s2282_s21, %s1738_s15  ;;  %p1741_p1 = scmp.lt.s32.totalorder %s1739_s18, %s1733_s9 }
 0x211   : > { %p1736_p4 = pneg %p1735_p2 }
 0x212   : > { %s2436_s17 = smov %s2435_s12  ;;  %s2278_s27 = scalar_lea.hbm %s2435_s12, %s2206_s30 }
 0x213   : > { %p1742_p12 = por %p1741_p1, %p1740_p8 }
 0x215   : > { %p1743_p11 = pnand %p1742_p12, %p1736_p4 }
 0x217   : > { %1746 = shalt.err (!%p1743_p11)
}
 0x218   : > { %s1747_s16 = scalar_lea.hbm %s2278_s27, 512  ;;  %s1751_s20 = scalar_lea.hbm %s2436_s17, 1024 }
 0x219   : > { %p1748_p13 = scmp.ne.s32.totalorder %s2278_s27, %s1747_s16  ;;  %p1752_p5 = scmp.lt.u32.totalorder %s2278_s27, %s2436_s17 }
 0x21a   : > { %p1753_p7 = scmp.lt.u32.totalorder %s1751_s20, %s1747_s16  ;;  %p1755_p0 = scmp.lt.u32.totalorder %s1747_s16, %s2278_s27 }
 0x21b   : > { %p1749_p6 = pnand %p1748_p13, %p2084_p10 }
 0x21c   : > { %p1754_p9 = por %p1753_p7, %p1752_p5 }
 0x21d   : > { %p1750_p3 = pneg %p1749_p6 }
 0x21e   : > { %p1756_p2 = por %p1755_p0, %p1754_p9 }
 0x220   : > { %p1757_p4 = pnand %p1756_p2, %p1750_p3 }
 0x222   : > { %1760 = shalt.err (!%p1757_p4)
}
 0x223   : > { %s2437_s9 = smov 128   ;;  %s2438_s18 = scalar_lea.sflag [#allocation4], %s2139_s7  ;;  %v1058_v14 = vcombine.low %v1030_v10, %v1037_v11  ;;  %v1394_v15 = vcombine.high %v1030_v10, %v1037_v11  ;;  %v1074_v16 = vcombine.low %v1046_v12, %v1053_v13  ;;  %v1395_v17 = vcombine.high %v1046_v12, %v1053_v13 }
 0x224   : > { %1490 = dma.vmem_to_hbm [thread:$0]  (%p2084_p10), %s2282_s21, 512, %s2278_s27, %s2438_s18, %s2437_s9, %s2437_s9, %s1873_s26  }
 0x225   : > { %v1065_v18 = vrot.slane %v1058_v14, %v2175_v43  ;;  %v1073_v19 = vrot.slane %v1394_v15, %v2175_v43  ;;  %v1081_v20 = vrot.slane %v1074_v16, %v2175_v43  ;;  %v1089_v21 = vrot.slane %v1395_v17, %v2175_v43  ;;  %s430_s7 = scalar_lea.vmem [#allocation13], %s2194_s25  ;;  %s2439_s23 = sld [smem:[#allocation23_spill]] }
 0x226   : > { %s1189_s29 = sshll.u32 %s430_s7, 4  ;;  %s2338_s29 = int_to_ptr.vmem [resolvable:$true] %s1189_s29 }
 0x227   : > { %v1090_v22 = vcombine.low %v1065_v18, %v1073_v19  ;;  %v1091_v23 = vcombine.high %v1065_v18, %v1073_v19  ;;  %v1106_v24 = vcombine.low %v1081_v20, %v1089_v21  ;;  %v1107_v25 = vcombine.high %v1081_v20, %v1089_v21  ;;  %s1761_s25 = scalar_lea.vmem %s2338_s29, 512 }
 0x228   : > { %p1762_p8 = scmp.ne.s32.totalorder %s2338_s29, %s1761_s25 }
 0x229   : > { %v1098_v26 = vrot.slane %v1090_v22, %v2177_v50  ;;  %v1105_v27 = vrot.slane %v1091_v23, %v2177_v50  ;;  %v1114_v28 = vrot.slane %v1106_v24, %v2177_v50  ;;  %v1121_v29 = vrot.slane %v1107_v25, %v2177_v50 }
 0x22a   : > { %p1763_p1 = pnand %p1762_p8, %p2084_p10 }
 0x22b   : > { %v1122_v30 = vcombine.low %v1098_v26, %v1114_v28  ;;  %v1123_v31 = vcombine.high %v1098_v26, %v1114_v28  ;;  %v1124_v33 = vcombine.low %v1105_v27, %v1121_v29  ;;  %v1125_v34 = vcombine.high %v1105_v27, %v1121_v29  ;;  %s2336_s16 = scalar_lea.hbm %s2439_s23, %s2206_s30  ;;  %s1875_s30 = smov [#allocation13]  }
 0x22c   : > { %p1764_p12 = pneg %p1763_p1  ;;  %s1765_s12 = sshll.u32 %s1875_s30, 4  ;;  %s1766_s12 = int_to_ptr.vmem [resolvable:$false] %s1765_s12 }
 0x22d   : > { %1126 = vst.msk [vmem:[%s430_s7] sm:$0xff] %vm663_vm2, %v1122_v30  ;;  %1127 = vst.msk [vmem:[%s430_s7 + $0x8] sm:$0xff] %vm663_vm2, %v1123_v31  ;;  %s1767_s20 = scalar_lea.vmem %s1766_s12, 1024  ;;  %p1768_p11 = scmp.lt.s32.totalorder %s2338_s29, %s1766_s12 }
 0x22e   : > { %1128 = vst.msk [vmem:[%s430_s7 + $0x10] sm:$0xff] %vm663_vm2, %v1124_v33  ;;  %1129 = vst.msk [vmem:[%s430_s7 + $0x18] sm:$0xff] %vm663_vm2, %v1125_v34  ;;  %p1769_p13 = scmp.lt.s32.totalorder %s1767_s20, %s1761_s25 }
 0x230   : > { %p1770_p6 = por %p1769_p13, %p1768_p11 }
 0x232   : > { %p1771_p3 = pnand %p1770_p6, %p1764_p12 }
 0x234   : > { %1774 = shalt.err (!%p1771_p3)
}
 0x235   : > { %s1775_s15 = scalar_lea.hbm %s2336_s16, 512  ;;  %s1779_s21 = scalar_lea.hbm %s2439_s23, 1024 }
 0x236   : > { %p1776_p5 = scmp.ne.s32.totalorder %s2336_s16, %s1775_s15  ;;  %p1780_p0 = scmp.lt.u32.totalorder %s2336_s16, %s2439_s23 }
 0x237   : > { %p1781_p2 = scmp.lt.u32.totalorder %s1779_s21, %s1775_s15  ;;  %p1783_p8 = scmp.lt.u32.totalorder %s1775_s15, %s2336_s16 }
 0x238   : > { %p1777_p7 = pnand %p1776_p5, %p2084_p10 }
 0x239   : > { %p1782_p4 = por %p1781_p2, %p1780_p0 }
 0x23a   : > { %p1778_p9 = pneg %p1777_p7 }
 0x23b   : > { %p1784_p1 = por %p1783_p8, %p1782_p4 }
 0x23d   : > { %p1785_p12 = pnand %p1784_p1, %p1778_p9 }
 0x23f   : > { %1788 = shalt.err (!%p1785_p12)
}
 0x240   : > { %1492 = dma.vmem_to_hbm [thread:$0]  (%p2084_p10), %s2338_s29, 512, %s2336_s16, %s2243_s24, %s2437_s9, %s2437_s9, %s1873_s26  }
 0x241 PF: > { %s2440_s25 = sld [smem:[#allocation19_spill]]  ;;  %s2441_s12 = sld [smem:[#allocation20_spill]] }
 0x242   : > { %p2443_p13 = scmp.ge.s32.totalorder %s1855_s14, 2 }
 0x247   : > { %s1204_s20 = sand.u32 1, %s2440_s25   ;;  %p2442_p11 = scmp.ne.s32.totalorder %s2441_s12, 0 }
 0x248   : > { %s1205_s15 = scalar_lea.sflag [#allocation4], %s1204_s20 }
 0x249   : > { %p1511_p6 = pnand %p2443_p13, %p2442_p11 }
 0x24b   : > { %1826 = dma.done.wait (!%p1511_p6), %s1205_s15, 512  }
 0x24c   : > { %1828 = vsyncadd (!%p1511_p6), %s1205_s15, 4294966784  ;;  %s2444_s8 = sadd.s32 4294967294, %s1855_s14  }
 0x24d   : > { %s1213_s18 = sand.u32 1, %s2444_s8  }
 0x24e   : > { %s1214_s7 = scalar_lea.sflag [#allocation12], %s1213_s18 }
 0x24f   : > { %1830 = dma.done.wait (!%p1511_p6), %s1214_s7, 1024  }
 0x250   : > { %1832 = vsyncadd (!%p1511_p6), %s1214_s7, 4294966272  ;;  %s31_s14 = sadd.s32 1, %s1855_s14   ;;  %s2445_s30 = smov %s1839_s10 }
 0x251   : > { %p28_p10 = scmp.ge.s32.totalorder %s31_s14, 4   ;;  %s2446_s10 = smov %s1843_s11 }
 0x252   : > { %s2447_s11 = smov %s2096_s28  ;;  %s2448_s12 = smov %s1851_s13 }
 0x253   : > { %s2449_s13 = smov %s2451_s22  ;;  %30 = sbr.rel (!%p28_p10) target bundleno = 14 (0xe), region = 137 }
 0x25a   :  { %1228 = vsyncpa [#allocation3], 1 }
 0x25b   :  { %1230 = vsyncpa [#allocation3 + $0x1], 1 }
 0x25c   :  { %1231 = vsyncpa [#allocation6], 1 }
 0x25d   :  { %1232 = vsyncpa [#allocation9], 1 }
 0x25e   :  { %1233 = vsyncpa [#allocation4], 1 }
 0x25f   :  { %1235 = vsyncpa [#allocation4 + $0x1], 1 }
 0x260   :  { %1236 = vsyncpa [#allocation12], 1 }
 0x261   :  { %1238 = vsyncpa [#allocation12 + $0x1], 1 }

</bundles_post_ra>
